<compile_context>
chip_gen: v7x
topology: tpu7x:2x2x1
jax: 0.10.0
libtpu: 0.0.40
codegen_flags: <defaults>
</compile_context>

<pallas_src>
import functools
import math

import jax
import jax.numpy as jnp
from jax.experimental import pallas as pl
from jax.experimental.pallas import tpu as pltpu

EPS = 1e-6  # Annotated-Transformer custom LayerNorm eps


def _layernorm(x, gamma, beta, eps=EPS):
    # matches: a_2 * (x - mean) / (std + eps) + b_2, torch unbiased std (ddof=1)
    d = x.shape[-1]
    mean = jnp.mean(x, axis=-1, keepdims=True)
    var = jnp.sum((x - mean) ** 2, axis=-1, keepdims=True) * (1.0 / (d - 1))
    inv = pl.reciprocal(jnp.sqrt(var) + eps, approx=True)  # EUP, not a VALU divide
    return gamma * (x - mean) * inv + beta


def encoder_layer_kernel(x_ref, mask_ref,
                         wq_ref, bq_ref, wkv_ref, bkv_ref, wo_ref, bo_ref,
                         ln1_g_ref, ln1_b_ref,
                         w1_ref, b1_ref, w2_ref, b2_ref,
                         ln2_g_ref, ln2_b_ref,
                         o_ref, *, num_heads, q_block, compute_dtype):
    f32 = jnp.float32
    H = num_heads
    tq = q_block

    x_full = x_ref[0]                      # (S, D) f32 — full sequence for this batch
    S, D = x_full.shape
    dk = D // H

    qi = pl.program_id(1)
    q0 = pl.multiple_of(qi * tq, tq)
    x_q = x_ref[0, pl.ds(q0, tq), :]       # (tq, D) residual rows for this query tile

    mask = mask_ref[0]                     # (1, S) f32; 1 = keep, 0 = masked

    ln1_g = ln1_g_ref[...]
    ln1_b = ln1_b_ref[...]

    # ---------------- sublayer 1: pre-norm self-attention + residual ----------------
    xn_full = _layernorm(x_full, ln1_g, ln1_b)           # for K/V (full sequence)
    xn_q = _layernorm(x_q, ln1_g, ln1_b)                 # for Q (query tile only)

    # lane-dense 2-D projections on the MXU (f32 accumulation)
    kv = jnp.dot(xn_full.astype(compute_dtype), wkv_ref[...],
                 preferred_element_type=f32) + bkv_ref[...]          # (S, 2D)
    q = jnp.dot(xn_q.astype(compute_dtype), wq_ref[...],
                preferred_element_type=f32) + bq_ref[...]            # (tq, D); scale pre-folded

    q_c = q.astype(compute_dtype)
    kv_c = kv.astype(compute_dtype)

    def split_heads(t2d):
        # (rows, H*dk) -> (H, rows, dk): static lane slices + leading-dim stack
        # (cheap O(rows*D) shuffle; avoids in-kernel reshape of the lane dim)
        return jnp.stack([t2d[:, h * dk:(h + 1) * dk] for h in range(H)], axis=0)

    qh = split_heads(q_c)                                 # (H, tq, dk)
    kh = split_heads(kv_c[:, :D])                         # (H, S,  dk)
    vh = split_heads(kv_c[:, D:])                         # (H, S,  dk)

    # head-batched scores in f32; additive mask bias computed once
    scores = jnp.einsum('hqd,hkd->hqk', qh, kh, preferred_element_type=f32)  # (H, tq, S)
    bias = jnp.where(mask == 0.0, f32(-1e9), f32(0.0))    # (1, S)
    scores = scores + bias[None, :, :]
    scores = scores - jnp.max(scores, axis=-1, keepdims=True)
    p = jnp.exp(scores)
    p = p * pl.reciprocal(jnp.sum(p, axis=-1, keepdims=True), approx=True)

    ctx = jnp.einsum('hqk,hkd->hqd', p.astype(compute_dtype), vh,
                     preferred_element_type=f32)          # (H, tq, dk)

    # merge heads on the lane dim (head-major == torch concat order), then ONE matmul
    ctx_c = ctx.astype(compute_dtype)
    ctx_flat = jnp.concatenate([ctx_c[h] for h in range(H)], axis=-1)        # (tq, D)
    attn = jnp.dot(ctx_flat, wo_ref[...], preferred_element_type=f32) + bo_ref[...]
    x1 = x_q + attn                                       # residual, f32 (stays in VMEM)

    # ---------------- sublayer 2: pre-norm position-wise FFN + residual -------------
    xn2 = _layernorm(x1, ln2_g_ref[...], ln2_b_ref[...]).astype(compute_dtype)
    h1 = jnp.dot(xn2, w1_ref[...], preferred_element_type=f32) + b1_ref[...]
    h1 = jnp.maximum(h1, 0.0).astype(compute_dtype)       # ReLU
    y = jnp.dot(h1, w2_ref[...], preferred_element_type=f32) + b2_ref[...]
    o_ref[0] = (x1 + y).astype(o_ref.dtype)


def _const_spec(shape):
    """Full-array spec, constant across the grid; single-buffered (fetched once)."""
    zeros = (0,) * len(shape)
    idx = lambda b, q: zeros
    if hasattr(pl, "Buffered"):
        try:
            return pl.BlockSpec(shape, idx, pipeline_mode=pl.Buffered(1))
        except TypeError:
            pass
    return pl.BlockSpec(shape, idx)


def encoder_layer(x, mask, params, num_heads, q_block=None, compute_dtype=jnp.bfloat16):
    B, S, D = x.shape
    H = num_heads
    dk = D // H
    d_ff = params["w1"].shape[1]

    if q_block is None:
        q_block = min(S, 256)
    assert S % q_block == 0, "S must be divisible by q_block"
    n_q = S // q_block

    # ---- one-time weight repacking (outside the kernel) ----
    scale = 1.0 / math.sqrt(dk)
    wq = (params["wq"] * scale).astype(compute_dtype)                       # (D, D), scale folded
    bq = (params["bq"] * scale).astype(jnp.float32)                         # (1, D)
    wkv = jnp.concatenate([params["wk"], params["wv"]], axis=1).astype(compute_dtype)  # (D, 2D)
    bkv = jnp.concatenate([params["bk"], params["bv"]], axis=1).astype(jnp.float32)    # (1, 2D)
    wo = params["wo"].astype(compute_dtype)                                 # (D, D)
    w1 = params["w1"].astype(compute_dtype)                                 # (D, d_ff)
    w2 = params["w2"].astype(compute_dtype)                                 # (d_ff, D)

    # ---- rough cost estimate so XLA schedules correctly around the custom call ----
    flops = (4 * B * n_q * S * D * D      # K/V projection (recomputed per query tile)
             + 2 * B * S * D * D          # Q projection
             + 4 * B * S * S * D          # QK^T + PV
             + 2 * B * S * D * D          # output projection
             + 4 * B * S * D * d_ff)      # FFN
    transcendentals = B * H * S * S + 8 * B * S
    bytes_w = (wq.size + wkv.size + wo.size + w1.size + w2.size) * 2
    bytes_b = (bq.size + bkv.size + params["bo"].size + params["b1"].size
               + params["b2"].size + 4 * D) * 4
    bytes_accessed = (2 * B * S * D + B * S) * 4 + bytes_w + bytes_b
    cost = pl.CostEstimate(flops=int(flops), transcendentals=int(transcendentals),
                           bytes_accessed=int(bytes_accessed))

    # ---- explicit VMEM budget: weights + per-block activations with headroom ----
    act = (2 * S * D * 4                  # x block (double-buffered)
           + 2 * q_block * D * 4          # out block (double-buffered)
           + 2 * S * 4                    # mask
           + S * 2 * D * 4                # kv
           + (S + q_block) * D * 2 * 2    # bf16 split-head copies of q/k/v
           + 3 * H * q_block * S * 4      # scores / p / slack
           + H * q_block * dk * 4         # ctx
           + 3 * q_block * D * 4          # x1 / attn / xn2
           + 2 * q_block * d_ff * 4)      # FFN hidden
    vmem_limit = int(min(max(2 * (bytes_w + bytes_b + act), 32 * 1024 * 1024),
                         64 * 1024 * 1024))

    kernel = functools.partial(encoder_layer_kernel, num_heads=H, q_block=q_block,
                               compute_dtype=compute_dtype)
    call = pl.pallas_call(
        kernel,
        out_shape=jax.ShapeDtypeStruct((B, S, D), x.dtype),
        grid=(B, n_q),
        in_specs=[
            pl.BlockSpec((1, S, D), lambda b, q: (b, 0, 0)),   # x (full seq, re-read per b only)
            pl.BlockSpec((1, 1, S), lambda b, q: (b, 0, 0)),   # mask
            _const_spec((D, D)),                               # Wq (scale folded)
            _const_spec((1, D)),                               # bq
            _const_spec((D, 2 * D)),                           # Wkv = [Wk | Wv]
            _const_spec((1, 2 * D)),                           # bkv
            _const_spec((D, D)),                               # Wo
            _const_spec((1, D)),                               # bo
            _const_spec((1, D)), _const_spec((1, D)),          # LN1 gamma, beta
            _const_spec((D, d_ff)), _const_spec((1, d_ff)),    # W1, b1
            _const_spec((d_ff, D)), _const_spec((1, D)),       # W2, b2
            _const_spec((1, D)), _const_spec((1, D)),          # LN2 gamma, beta
        ],
        out_specs=pl.BlockSpec((1, q_block, D), lambda b, q: (b, q, 0)),
        compiler_params=pltpu.CompilerParams(
            dimension_semantics=("parallel", "parallel"),
            vmem_limit_bytes=vmem_limit),
        cost_estimate=cost,
    )
    return call(x, mask, wq, bq, wkv, bkv, wo, params["bo"],
                params["ln1_g"], params["ln1_b"],
                w1, params["b1"], w2, params["b2"],
                params["ln2_g"], params["ln2_b"])


def make_params(key, d_model, d_ff):
    ks = jax.random.split(key, 12)
    s = 0.1
    return {
        "wq": s * jax.random.normal(ks[0], (d_model, d_model), jnp.float32),
        "wk": s * jax.random.normal(ks[1], (d_model, d_model), jnp.float32),
        "wv": s * jax.random.normal(ks[2], (d_model, d_model), jnp.float32),
        "wo": s * jax.random.normal(ks[3], (d_model, d_model), jnp.float32),
        "bq": s * jax.random.normal(ks[4], (1, d_model), jnp.float32),
        "bk": s * jax.random.normal(ks[5], (1, d_model), jnp.float32),
        "bv": s * jax.random.normal(ks[6], (1, d_model), jnp.float32),
        "bo": s * jax.random.normal(ks[7], (1, d_model), jnp.float32),
        "w1": s * jax.random.normal(ks[8], (d_model, d_ff), jnp.float32),
        "b1": s * jax.random.normal(ks[9], (1, d_ff), jnp.float32),
        "w2": s * jax.random.normal(ks[10], (d_ff, d_model), jnp.float32),
        "b2": s * jax.random.normal(ks[11], (1, d_model), jnp.float32),
        "ln1_g": jnp.ones((1, d_model), jnp.float32),
        "ln1_b": jnp.zeros((1, d_model), jnp.float32),
        "ln2_g": jnp.ones((1, d_model), jnp.float32),
        "ln2_b": jnp.zeros((1, d_model), jnp.float32),
    }


def encoder_layer_ref(x, mask, params, num_heads):
    # pure-JAX f32 reference (same math as the PyTorch module, eval mode)
    def ln(t, g, b):
        d = t.shape[-1]
        mean = jnp.mean(t, -1, keepdims=True)
        var = jnp.sum((t - mean) ** 2, -1, keepdims=True) / (d - 1)
        return g * (t - mean) / (jnp.sqrt(var) + EPS) + b

    B, S, D = x.shape
    H = num_heads
    dk = D // H
    xn = ln(x, params["ln1_g"], params["ln1_b"])
    q = xn @ params["wq"] + params["bq"]
    k = xn @ params["wk"] + params["bk"]
    v = xn @ params["wv"] + params["bv"]

    def heads(t):
        return t.reshape(B, S, H, dk).transpose(0, 2, 1, 3)

    qh, kh, vh = heads(q), heads(k), heads(v)
    sc = jnp.einsum('bhqd,bhkd->bhqk', qh, kh) / jnp.sqrt(jnp.float32(dk))
    sc = jnp.where(mask[:, None, :, :] == 0, -1e9, sc)
    p = jax.nn.softmax(sc, axis=-1)
    ctx = jnp.einsum('bhqk,bhkd->bhqd', p, vh).transpose(0, 2, 1, 3).reshape(B, S, D)
    x1 = x + ctx @ params["wo"] + params["bo"]

    xn2 = ln(x1, params["ln2_g"], params["ln2_b"])
    h = jnp.maximum(xn2 @ params["w1"] + params["b1"], 0.0)
    return x1 + h @ params["w2"] + params["b2"]


if __name__ == "__main__":
    # small shapes; q_block=8 over S=16 exercises the 2-query-tile path (grid = (2, 2))
    B, S, D, H, D_FF, QB = 2, 16, 32, 4, 64, 8
    key = jax.random.PRNGKey(0)
    k_x, k_p = jax.random.split(key)

    x = jax.random.normal(k_x, (B, S, D), jnp.float32)
    # mask: 1.0 = attend, 0.0 = masked (last three positions masked for batch 1)
    mask = jnp.ones((B, 1, S), jnp.float32)
    mask = mask.at[1, 0, -3:].set(0.0)

    params = make_params(k_p, D, D_FF)

    out = encoder_layer(x, mask, params, num_heads=H, q_block=QB)
    out = jax.block_until_ready(out)
    assert out.shape == (B, S, D) and out.dtype == jnp.float32

    ref = encoder_layer_ref(x, mask, params, num_heads=H)
    err = float(jnp.max(jnp.abs(out - ref)))
    assert err < 1e-1, f"max abs error vs reference too large: {err}"
    print("KERNEL_OK")
</pallas_src>

<mosaic_0001>
module attributes {stable_mosaic.version = 11 : i64} {
  func.func @encoder_layer_kernel(%arg0: i32, %arg1: i32, %arg2: memref<1x16x32xf32, #tpu.memory_space<vmem>>, %arg3: memref<1x1x16xf32, #tpu.memory_space<vmem>>, %arg4: memref<32x32xbf16, #tpu.memory_space<vmem>>, %arg5: memref<1x32xf32, #tpu.memory_space<vmem>>, %arg6: memref<32x64xbf16, #tpu.memory_space<vmem>>, %arg7: memref<1x64xf32, #tpu.memory_space<vmem>>, %arg8: memref<32x32xbf16, #tpu.memory_space<vmem>>, %arg9: memref<1x32xf32, #tpu.memory_space<vmem>>, %arg10: memref<1x32xf32, #tpu.memory_space<vmem>>, %arg11: memref<1x32xf32, #tpu.memory_space<vmem>>, %arg12: memref<32x64xbf16, #tpu.memory_space<vmem>>, %arg13: memref<1x64xf32, #tpu.memory_space<vmem>>, %arg14: memref<64x32xbf16, #tpu.memory_space<vmem>>, %arg15: memref<1x32xf32, #tpu.memory_space<vmem>>, %arg16: memref<1x32xf32, #tpu.memory_space<vmem>>, %arg17: memref<1x32xf32, #tpu.memory_space<vmem>>, %arg18: memref<1x8x32xf32, #tpu.memory_space<vmem>>) attributes {dimension_semantics = [#tpu.dimension_semantics<parallel>, #tpu.dimension_semantics<parallel>], iteration_bounds = array<i64: 2, 2>, scalar_prefetch = 0 : i64, scratch_operands = 0 : i64, tpu.core_type = #tpu.core_type<tc>, window_params = [{transform_indices = @transform_0, window_bounds = array<i64: 1, 16, 32>}, {transform_indices = @transform_1, window_bounds = array<i64: 1, 1, 16>}, {pipeline_mode = #tpu.pipeline_mode<synchronous>, transform_indices = @transform_2, window_bounds = array<i64: 32, 32>}, {pipeline_mode = #tpu.pipeline_mode<synchronous>, transform_indices = @transform_3, window_bounds = array<i64: 1, 32>}, {pipeline_mode = #tpu.pipeline_mode<synchronous>, transform_indices = @transform_4, window_bounds = array<i64: 32, 64>}, {pipeline_mode = #tpu.pipeline_mode<synchronous>, transform_indices = @transform_5, window_bounds = array<i64: 1, 64>}, {pipeline_mode = #tpu.pipeline_mode<synchronous>, transform_indices = @transform_6, window_bounds = array<i64: 32, 32>}, {pipeline_mode = #tpu.pipeline_mode<synchronous>, transform_indices = @transform_7, window_bounds = array<i64: 1, 32>}, {pipeline_mode = #tpu.pipeline_mode<synchronous>, transform_indices = @transform_8, window_bounds = array<i64: 1, 32>}, {pipeline_mode = #tpu.pipeline_mode<synchronous>, transform_indices = @transform_9, window_bounds = array<i64: 1, 32>}, {pipeline_mode = #tpu.pipeline_mode<synchronous>, transform_indices = @transform_10, window_bounds = array<i64: 32, 64>}, {pipeline_mode = #tpu.pipeline_mode<synchronous>, transform_indices = @transform_11, window_bounds = array<i64: 1, 64>}, {pipeline_mode = #tpu.pipeline_mode<synchronous>, transform_indices = @transform_12, window_bounds = array<i64: 64, 32>}, {pipeline_mode = #tpu.pipeline_mode<synchronous>, transform_indices = @transform_13, window_bounds = array<i64: 1, 32>}, {pipeline_mode = #tpu.pipeline_mode<synchronous>, transform_indices = @transform_14, window_bounds = array<i64: 1, 32>}, {pipeline_mode = #tpu.pipeline_mode<synchronous>, transform_indices = @transform_15, window_bounds = array<i64: 1, 32>}, {transform_indices = @transform_16, window_bounds = array<i64: 1, 8, 32>}]} {
    %c0 = arith.constant 0 : index
    %c0_0 = arith.constant 0 : index
    %c0_1 = arith.constant 0 : index
    %0 = vector.load %arg2[%c0, %c0_0, %c0_1] : memref<1x16x32xf32, #tpu.memory_space<vmem>>, vector<1x16x32xf32>
    %1 = vector.shape_cast %0 : vector<1x16x32xf32> to vector<16x32xf32>
    %c8_i32 = arith.constant 8 : i32
    %2 = arith.muli %arg1, %c8_i32 : i32
    %3 = tpu.assume_multiple %2, 8 : i32
    %c0_2 = arith.constant 0 : index
    %4 = arith.index_cast %3 : i32 to index
    %c0_3 = arith.constant 0 : index
    %5 = vector.load %arg2[%c0_2, %4, %c0_3] : memref<1x16x32xf32, #tpu.memory_space<vmem>>, vector<1x8x32xf32>
    %6 = vector.shape_cast %5 : vector<1x8x32xf32> to vector<8x32xf32>
    %c0_4 = arith.constant 0 : index
    %c0_5 = arith.constant 0 : index
    %c0_6 = arith.constant 0 : index
    %7 = vector.load %arg3[%c0_4, %c0_5, %c0_6] : memref<1x1x16xf32, #tpu.memory_space<vmem>>, vector<1x1x16xf32>
    %8 = vector.shape_cast %7 : vector<1x1x16xf32> to vector<1x16xf32>
    %c0_7 = arith.constant 0 : index
    %c0_8 = arith.constant 0 : index
    %9 = vector.load %arg10[%c0_7, %c0_8] : memref<1x32xf32, #tpu.memory_space<vmem>>, vector<1x32xf32>
    %c0_9 = arith.constant 0 : index
    %c0_10 = arith.constant 0 : index
    %10 = vector.load %arg11[%c0_9, %c0_10] : memref<1x32xf32, #tpu.memory_space<vmem>>, vector<1x32xf32>
    %cst = arith.constant dense<0.000000e+00> : vector<16xf32>
    %11 = vector.multi_reduction <add>, %1, %cst [1] : vector<16x32xf32> to vector<16xf32>
    %12 = vector.shape_cast %11 : vector<16xf32> to vector<16x1xf32>
    %cst_11 = arith.constant 3.200000e+01 : f32
    %13 = vector.broadcast %cst_11 : f32 to vector<16x1xf32>
    %14 = arith.divf %12, %13 : vector<16x1xf32>
    %15 = vector.broadcast %14 : vector<16x1xf32> to vector<16x32xf32>
    %16 = arith.subf %1, %15 : vector<16x32xf32>
    %17 = arith.mulf %16, %16 : vector<16x32xf32>
    %cst_12 = arith.constant dense<0.000000e+00> : vector<16xf32>
    %18 = vector.multi_reduction <add>, %17, %cst_12 [1] : vector<16x32xf32> to vector<16xf32>
    %19 = vector.shape_cast %18 : vector<16xf32> to vector<16x1xf32>
    %cst_13 = arith.constant 0.0322580636 : f32
    %20 = vector.broadcast %cst_13 : f32 to vector<16x1xf32>
    %21 = arith.mulf %19, %20 : vector<16x1xf32>
    %22 = math.sqrt %21 : vector<16x1xf32>
    %cst_14 = arith.constant 9.99999997E-7 : f32
    %23 = vector.broadcast %cst_14 : f32 to vector<16x1xf32>
    %24 = arith.addf %22, %23 : vector<16x1xf32>
    %25 = tpu.reciprocal %24 {approx = true} : vector<16x1xf32> -> vector<16x1xf32>
    %26 = vector.broadcast %14 : vector<16x1xf32> to vector<16x32xf32>
    %27 = arith.subf %1, %26 : vector<16x32xf32>
    %28 = vector.broadcast %9 : vector<1x32xf32> to vector<16x32xf32>
    %29 = arith.mulf %28, %27 : vector<16x32xf32>
    %30 = vector.broadcast %25 : vector<16x1xf32> to vector<16x32xf32>
    %31 = arith.mulf %29, %30 : vector<16x32xf32>
    %32 = vector.broadcast %10 : vector<1x32xf32> to vector<16x32xf32>
    %33 = arith.addf %31, %32 : vector<16x32xf32>
    %cst_15 = arith.constant dense<0.000000e+00> : vector<8xf32>
    %34 = vector.multi_reduction <add>, %6, %cst_15 [1] : vector<8x32xf32> to vector<8xf32>
    %35 = vector.shape_cast %34 : vector<8xf32> to vector<8x1xf32>
    %cst_16 = arith.constant 3.200000e+01 : f32
    %36 = vector.broadcast %cst_16 : f32 to vector<8x1xf32>
    %37 = arith.divf %35, %36 : vector<8x1xf32>
    %38 = vector.broadcast %37 : vector<8x1xf32> to vector<8x32xf32>
    %39 = arith.subf %6, %38 : vector<8x32xf32>
    %40 = arith.mulf %39, %39 : vector<8x32xf32>
    %cst_17 = arith.constant dense<0.000000e+00> : vector<8xf32>
    %41 = vector.multi_reduction <add>, %40, %cst_17 [1] : vector<8x32xf32> to vector<8xf32>
    %42 = vector.shape_cast %41 : vector<8xf32> to vector<8x1xf32>
    %cst_18 = arith.constant 0.0322580636 : f32
    %43 = vector.broadcast %cst_18 : f32 to vector<8x1xf32>
    %44 = arith.mulf %42, %43 : vector<8x1xf32>
    %45 = math.sqrt %44 : vector<8x1xf32>
    %cst_19 = arith.constant 9.99999997E-7 : f32
    %46 = vector.broadcast %cst_19 : f32 to vector<8x1xf32>
    %47 = arith.addf %45, %46 : vector<8x1xf32>
    %48 = tpu.reciprocal %47 {approx = true} : vector<8x1xf32> -> vector<8x1xf32>
    %49 = vector.broadcast %37 : vector<8x1xf32> to vector<8x32xf32>
    %50 = arith.subf %6, %49 : vector<8x32xf32>
    %51 = vector.broadcast %9 : vector<1x32xf32> to vector<8x32xf32>
    %52 = arith.mulf %51, %50 : vector<8x32xf32>
    %53 = vector.broadcast %48 : vector<8x1xf32> to vector<8x32xf32>
    %54 = arith.mulf %52, %53 : vector<8x32xf32>
    %55 = vector.broadcast %10 : vector<1x32xf32> to vector<8x32xf32>
    %56 = arith.addf %54, %55 : vector<8x32xf32>
    %57 = arith.truncf %33 : vector<16x32xf32> to vector<16x32xbf16>
    %c0_20 = arith.constant 0 : index
    %c0_21 = arith.constant 0 : index
    %58 = vector.load %arg6[%c0_20, %c0_21] : memref<32x64xbf16, #tpu.memory_space<vmem>>, vector<32x64xbf16>
    %cst_22 = arith.constant dense<0.000000e+00> : vector<16x64xf32>
    %59 = tpu.matmul %57, %58, %cst_22 {dimension_numbers = #tpu.dot_dimension_numbers<[1], [0], [0], [1], [0, 0, 1, 1], [], []>} : vector<16x32xbf16>, vector<32x64xbf16>, vector<16x64xf32> -> vector<16x64xf32>
    %c0_23 = arith.constant 0 : index
    %c0_24 = arith.constant 0 : index
    %60 = vector.load %arg7[%c0_23, %c0_24] : memref<1x64xf32, #tpu.memory_space<vmem>>, vector<1x64xf32>
    %61 = vector.broadcast %60 : vector<1x64xf32> to vector<16x64xf32>
    %62 = arith.addf %59, %61 : vector<16x64xf32>
    %63 = arith.truncf %56 : vector<8x32xf32> to vector<8x32xbf16>
    %c0_25 = arith.constant 0 : index
    %c0_26 = arith.constant 0 : index
    %64 = vector.load %arg4[%c0_25, %c0_26] : memref<32x32xbf16, #tpu.memory_space<vmem>>, vector<32x32xbf16>
    %cst_27 = arith.constant dense<0.000000e+00> : vector<8x32xf32>
    %65 = tpu.matmul %63, %64, %cst_27 {dimension_numbers = #tpu.dot_dimension_numbers<[1], [0], [0], [1], [0, 0, 1, 1], [], []>} : vector<8x32xbf16>, vector<32x32xbf16>, vector<8x32xf32> -> vector<8x32xf32>
    %c0_28 = arith.constant 0 : index
    %c0_29 = arith.constant 0 : index
    %66 = vector.load %arg5[%c0_28, %c0_29] : memref<1x32xf32, #tpu.memory_space<vmem>>, vector<1x32xf32>
    %67 = vector.broadcast %66 : vector<1x32xf32> to vector<8x32xf32>
    %68 = arith.addf %65, %67 : vector<8x32xf32>
    %69 = arith.truncf %68 : vector<8x32xf32> to vector<8x32xbf16>
    %70 = arith.truncf %62 : vector<16x64xf32> to vector<16x64xbf16>
    %71 = vector.extract_strided_slice %69 {offsets = [0, 0], sizes = [8, 8], strides = [1, 1]} : vector<8x32xbf16> to vector<8x8xbf16>
    %72 = vector.extract_strided_slice %69 {offsets = [0, 8], sizes = [8, 8], strides = [1, 1]} : vector<8x32xbf16> to vector<8x8xbf16>
    %73 = vector.extract_strided_slice %69 {offsets = [0, 16], sizes = [8, 8], strides = [1, 1]} : vector<8x32xbf16> to vector<8x8xbf16>
    %74 = vector.extract_strided_slice %69 {offsets = [0, 24], sizes = [8, 8], strides = [1, 1]} : vector<8x32xbf16> to vector<8x8xbf16>
    %75 = vector.shape_cast %71 : vector<8x8xbf16> to vector<1x8x8xbf16>
    %76 = vector.shape_cast %72 : vector<8x8xbf16> to vector<1x8x8xbf16>
    %77 = vector.shape_cast %73 : vector<8x8xbf16> to vector<1x8x8xbf16>
    %78 = vector.shape_cast %74 : vector<8x8xbf16> to vector<1x8x8xbf16>
    %79 = tpu.concatenate %75, %76, %77, %78 in 0 : vector<1x8x8xbf16>, vector<1x8x8xbf16>, vector<1x8x8xbf16>, vector<1x8x8xbf16> -> vector<4x8x8xbf16>
    %80 = vector.extract_strided_slice %70 {offsets = [0, 0], sizes = [16, 32], strides = [1, 1]} : vector<16x64xbf16> to vector<16x32xbf16>
    %81 = vector.extract_strided_slice %80 {offsets = [0, 0], sizes = [16, 8], strides = [1, 1]} : vector<16x32xbf16> to vector<16x8xbf16>
    %82 = vector.extract_strided_slice %80 {offsets = [0, 8], sizes = [16, 8], strides = [1, 1]} : vector<16x32xbf16> to vector<16x8xbf16>
    %83 = vector.extract_strided_slice %80 {offsets = [0, 16], sizes = [16, 8], strides = [1, 1]} : vector<16x32xbf16> to vector<16x8xbf16>
    %84 = vector.extract_strided_slice %80 {offsets = [0, 24], sizes = [16, 8], strides = [1, 1]} : vector<16x32xbf16> to vector<16x8xbf16>
    %85 = vector.shape_cast %81 : vector<16x8xbf16> to vector<1x16x8xbf16>
    %86 = vector.shape_cast %82 : vector<16x8xbf16> to vector<1x16x8xbf16>
    %87 = vector.shape_cast %83 : vector<16x8xbf16> to vector<1x16x8xbf16>
    %88 = vector.shape_cast %84 : vector<16x8xbf16> to vector<1x16x8xbf16>
    %89 = tpu.concatenate %85, %86, %87, %88 in 0 : vector<1x16x8xbf16>, vector<1x16x8xbf16>, vector<1x16x8xbf16>, vector<1x16x8xbf16> -> vector<4x16x8xbf16>
    %90 = vector.extract_strided_slice %70 {offsets = [0, 32], sizes = [16, 32], strides = [1, 1]} : vector<16x64xbf16> to vector<16x32xbf16>
    %91 = vector.extract_strided_slice %90 {offsets = [0, 0], sizes = [16, 8], strides = [1, 1]} : vector<16x32xbf16> to vector<16x8xbf16>
    %92 = vector.extract_strided_slice %90 {offsets = [0, 8], sizes = [16, 8], strides = [1, 1]} : vector<16x32xbf16> to vector<16x8xbf16>
    %93 = vector.extract_strided_slice %90 {offsets = [0, 16], sizes = [16, 8], strides = [1, 1]} : vector<16x32xbf16> to vector<16x8xbf16>
    %94 = vector.extract_strided_slice %90 {offsets = [0, 24], sizes = [16, 8], strides = [1, 1]} : vector<16x32xbf16> to vector<16x8xbf16>
    %95 = vector.shape_cast %91 : vector<16x8xbf16> to vector<1x16x8xbf16>
    %96 = vector.shape_cast %92 : vector<16x8xbf16> to vector<1x16x8xbf16>
    %97 = vector.shape_cast %93 : vector<16x8xbf16> to vector<1x16x8xbf16>
    %98 = vector.shape_cast %94 : vector<16x8xbf16> to vector<1x16x8xbf16>
    %99 = tpu.concatenate %95, %96, %97, %98 in 0 : vector<1x16x8xbf16>, vector<1x16x8xbf16>, vector<1x16x8xbf16>, vector<1x16x8xbf16> -> vector<4x16x8xbf16>
    "tpu.trace_start"() <{level = 10 : i32, message = "hqd,hkd->hqk"}> : () -> ()
    %cst_30 = arith.constant dense<0.000000e+00> : vector<4x8x16xf32>
    %100 = tpu.matmul %79, %89, %cst_30 {dimension_numbers = #tpu.dot_dimension_numbers<[2], [2], [1], [1], [0, 0, 0, 1, 1, 1], [0], [0]>} : vector<4x8x8xbf16>, vector<4x16x8xbf16>, vector<4x8x16xf32> -> vector<4x8x16xf32>
    %cst_31 = arith.constant 0.000000e+00 : f32
    "tpu.trace_stop"() : () -> ()
    %101 = vector.broadcast %cst_31 : f32 to vector<1x16xf32>
    %102 = arith.cmpf oeq, %8, %101 : vector<1x16xf32>
    %cst_32 = arith.constant -1.000000e+09 : f32
    %cst_33 = arith.constant 0.000000e+00 : f32
    %103 = vector.broadcast %cst_32 : f32 to vector<1x16xf32>
    %104 = vector.broadcast %cst_33 : f32 to vector<1x16xf32>
    %105 = arith.select %102, %103, %104 : vector<1x16xi1>, vector<1x16xf32>
    %106 = vector.shape_cast %105 : vector<1x16xf32> to vector<1x1x16xf32>
    %107 = vector.broadcast %106 : vector<1x1x16xf32> to vector<4x8x16xf32>
    %108 = arith.addf %100, %107 : vector<4x8x16xf32>
    %cst_34 = arith.constant dense<0xFF800000> : vector<4x8xf32>
    %109 = vector.multi_reduction <maximumf>, %108, %cst_34 [2] : vector<4x8x16xf32> to vector<4x8xf32>
    %110 = vector.shape_cast %109 : vector<4x8xf32> to vector<4x8x1xf32>
    %111 = vector.broadcast %110 : vector<4x8x1xf32> to vector<4x8x16xf32>
    %112 = arith.subf %108, %111 : vector<4x8x16xf32>
    %113 = math.exp %112 : vector<4x8x16xf32>
    %cst_35 = arith.constant dense<0.000000e+00> : vector<4x8xf32>
    %114 = vector.multi_reduction <add>, %113, %cst_35 [2] : vector<4x8x16xf32> to vector<4x8xf32>
    %115 = vector.shape_cast %114 : vector<4x8xf32> to vector<4x8x1xf32>
    %116 = tpu.reciprocal %115 {approx = true} : vector<4x8x1xf32> -> vector<4x8x1xf32>
    %117 = vector.broadcast %116 : vector<4x8x1xf32> to vector<4x8x16xf32>
    %118 = arith.mulf %113, %117 : vector<4x8x16xf32>
    %119 = arith.truncf %118 : vector<4x8x16xf32> to vector<4x8x16xbf16>
    "tpu.trace_start"() <{level = 10 : i32, message = "hqk,hkd->hqd"}> : () -> ()
    %cst_36 = arith.constant dense<0.000000e+00> : vector<4x8x8xf32>
    %120 = tpu.matmul %119, %99, %cst_36 {dimension_numbers = #tpu.dot_dimension_numbers<[2], [1], [1], [2], [0, 0, 0, 1, 1, 2], [0], [0]>} : vector<4x8x16xbf16>, vector<4x16x8xbf16>, vector<4x8x8xf32> -> vector<4x8x8xf32>
    "tpu.trace_stop"() : () -> ()
    %121 = arith.truncf %120 : vector<4x8x8xf32> to vector<4x8x8xbf16>
    %122 = vector.extract_strided_slice %121 {offsets = [0, 0, 0], sizes = [1, 8, 8], strides = [1, 1, 1]} : vector<4x8x8xbf16> to vector<1x8x8xbf16>
    %123 = vector.shape_cast %122 : vector<1x8x8xbf16> to vector<8x8xbf16>
    %124 = vector.extract_strided_slice %121 {offsets = [1, 0, 0], sizes = [1, 8, 8], strides = [1, 1, 1]} : vector<4x8x8xbf16> to vector<1x8x8xbf16>
    %125 = vector.shape_cast %124 : vector<1x8x8xbf16> to vector<8x8xbf16>
    %126 = vector.extract_strided_slice %121 {offsets = [2, 0, 0], sizes = [1, 8, 8], strides = [1, 1, 1]} : vector<4x8x8xbf16> to vector<1x8x8xbf16>
    %127 = vector.shape_cast %126 : vector<1x8x8xbf16> to vector<8x8xbf16>
    %128 = vector.extract_strided_slice %121 {offsets = [3, 0, 0], sizes = [1, 8, 8], strides = [1, 1, 1]} : vector<4x8x8xbf16> to vector<1x8x8xbf16>
    %129 = vector.shape_cast %128 : vector<1x8x8xbf16> to vector<8x8xbf16>
    %130 = tpu.concatenate %123, %125, %127, %129 in 1 : vector<8x8xbf16>, vector<8x8xbf16>, vector<8x8xbf16>, vector<8x8xbf16> -> vector<8x32xbf16>
    %c0_37 = arith.constant 0 : index
    %c0_38 = arith.constant 0 : index
    %131 = vector.load %arg8[%c0_37, %c0_38] : memref<32x32xbf16, #tpu.memory_space<vmem>>, vector<32x32xbf16>
    %cst_39 = arith.constant dense<0.000000e+00> : vector<8x32xf32>
    %132 = tpu.matmul %130, %131, %cst_39 {dimension_numbers = #tpu.dot_dimension_numbers<[1], [0], [0], [1], [0, 0, 1, 1], [], []>} : vector<8x32xbf16>, vector<32x32xbf16>, vector<8x32xf32> -> vector<8x32xf32>
    %c0_40 = arith.constant 0 : index
    %c0_41 = arith.constant 0 : index
    %133 = vector.load %arg9[%c0_40, %c0_41] : memref<1x32xf32, #tpu.memory_space<vmem>>, vector<1x32xf32>
    %134 = vector.broadcast %133 : vector<1x32xf32> to vector<8x32xf32>
    %135 = arith.addf %132, %134 : vector<8x32xf32>
    %136 = arith.addf %6, %135 : vector<8x32xf32>
    %c0_42 = arith.constant 0 : index
    %c0_43 = arith.constant 0 : index
    %137 = vector.load %arg16[%c0_42, %c0_43] : memref<1x32xf32, #tpu.memory_space<vmem>>, vector<1x32xf32>
    %c0_44 = arith.constant 0 : index
    %c0_45 = arith.constant 0 : index
    %138 = vector.load %arg17[%c0_44, %c0_45] : memref<1x32xf32, #tpu.memory_space<vmem>>, vector<1x32xf32>
    %cst_46 = arith.constant dense<0.000000e+00> : vector<8xf32>
    %139 = vector.multi_reduction <add>, %136, %cst_46 [1] : vector<8x32xf32> to vector<8xf32>
    %140 = vector.shape_cast %139 : vector<8xf32> to vector<8x1xf32>
    %cst_47 = arith.constant 3.200000e+01 : f32
    %141 = vector.broadcast %cst_47 : f32 to vector<8x1xf32>
    %142 = arith.divf %140, %141 : vector<8x1xf32>
    %143 = vector.broadcast %142 : vector<8x1xf32> to vector<8x32xf32>
    %144 = arith.subf %136, %143 : vector<8x32xf32>
    %145 = arith.mulf %144, %144 : vector<8x32xf32>
    %cst_48 = arith.constant dense<0.000000e+00> : vector<8xf32>
    %146 = vector.multi_reduction <add>, %145, %cst_48 [1] : vector<8x32xf32> to vector<8xf32>
    %147 = vector.shape_cast %146 : vector<8xf32> to vector<8x1xf32>
    %cst_49 = arith.constant 0.0322580636 : f32
    %148 = vector.broadcast %cst_49 : f32 to vector<8x1xf32>
    %149 = arith.mulf %147, %148 : vector<8x1xf32>
    %150 = math.sqrt %149 : vector<8x1xf32>
    %cst_50 = arith.constant 9.99999997E-7 : f32
    %151 = vector.broadcast %cst_50 : f32 to vector<8x1xf32>
    %152 = arith.addf %150, %151 : vector<8x1xf32>
    %153 = tpu.reciprocal %152 {approx = true} : vector<8x1xf32> -> vector<8x1xf32>
    %154 = vector.broadcast %142 : vector<8x1xf32> to vector<8x32xf32>
    %155 = arith.subf %136, %154 : vector<8x32xf32>
    %156 = vector.broadcast %137 : vector<1x32xf32> to vector<8x32xf32>
    %157 = arith.mulf %156, %155 : vector<8x32xf32>
    %158 = vector.broadcast %153 : vector<8x1xf32> to vector<8x32xf32>
    %159 = arith.mulf %157, %158 : vector<8x32xf32>
    %160 = vector.broadcast %138 : vector<1x32xf32> to vector<8x32xf32>
    %161 = arith.addf %159, %160 : vector<8x32xf32>
    %162 = arith.truncf %161 : vector<8x32xf32> to vector<8x32xbf16>
    %c0_51 = arith.constant 0 : index
    %c0_52 = arith.constant 0 : index
    %163 = vector.load %arg12[%c0_51, %c0_52] : memref<32x64xbf16, #tpu.memory_space<vmem>>, vector<32x64xbf16>
    %cst_53 = arith.constant dense<0.000000e+00> : vector<8x64xf32>
    %164 = tpu.matmul %162, %163, %cst_53 {dimension_numbers = #tpu.dot_dimension_numbers<[1], [0], [0], [1], [0, 0, 1, 1], [], []>} : vector<8x32xbf16>, vector<32x64xbf16>, vector<8x64xf32> -> vector<8x64xf32>
    %c0_54 = arith.constant 0 : index
    %c0_55 = arith.constant 0 : index
    %165 = vector.load %arg13[%c0_54, %c0_55] : memref<1x64xf32, #tpu.memory_space<vmem>>, vector<1x64xf32>
    %166 = vector.broadcast %165 : vector<1x64xf32> to vector<8x64xf32>
    %167 = arith.addf %164, %166 : vector<8x64xf32>
    %cst_56 = arith.constant 0.000000e+00 : f32
    %168 = vector.broadcast %cst_56 : f32 to vector<8x64xf32>
    %169 = arith.maximumf %167, %168 : vector<8x64xf32>
    %170 = arith.truncf %169 : vector<8x64xf32> to vector<8x64xbf16>
    %c0_57 = arith.constant 0 : index
    %c0_58 = arith.constant 0 : index
    %171 = vector.load %arg14[%c0_57, %c0_58] : memref<64x32xbf16, #tpu.memory_space<vmem>>, vector<64x32xbf16>
    %cst_59 = arith.constant dense<0.000000e+00> : vector<8x32xf32>
    %172 = tpu.matmul %170, %171, %cst_59 {dimension_numbers = #tpu.dot_dimension_numbers<[1], [0], [0], [1], [0, 0, 1, 1], [], []>} : vector<8x64xbf16>, vector<64x32xbf16>, vector<8x32xf32> -> vector<8x32xf32>
    %c0_60 = arith.constant 0 : index
    %c0_61 = arith.constant 0 : index
    %173 = vector.load %arg15[%c0_60, %c0_61] : memref<1x32xf32, #tpu.memory_space<vmem>>, vector<1x32xf32>
    %174 = vector.broadcast %173 : vector<1x32xf32> to vector<8x32xf32>
    %175 = arith.addf %172, %174 : vector<8x32xf32>
    %176 = arith.addf %136, %175 : vector<8x32xf32>
    %c0_62 = arith.constant 0 : index
    %c0_63 = arith.constant 0 : index
    %c0_64 = arith.constant 0 : index
    %177 = vector.load %arg18[%c0_62, %c0_63, %c0_64] : memref<1x8x32xf32, #tpu.memory_space<vmem>>, vector<1x8x32xf32>
    %178 = vector.shape_cast %177 : vector<1x8x32xf32> to vector<8x32xf32>
    %179 = vector.shape_cast %176 : vector<8x32xf32> to vector<1x8x32xf32>
    tpu.vector_store %arg18[%c0_62, %c0_63, %c0_64], %179 {strides = array<i32>} : memref<1x8x32xf32, #tpu.memory_space<vmem>>, vector<1x8x32xf32>,
    return
  }
  func.func @transform_0(%arg0: i32, %arg1: i32) -> (i32, i32, i32) {
    %c0_i32 = arith.constant 0 : i32
    %c0_i32_0 = arith.constant 0 : i32
    %c0_i32_1 = arith.constant 0 : i32
    return %arg0, %c0_i32, %c0_i32_0 : i32, i32, i32
  }
  func.func @transform_1(%arg0: i32, %arg1: i32) -> (i32, i32, i32) {
    %c0_i32 = arith.constant 0 : i32
    %c0_i32_0 = arith.constant 0 : i32
    %c0_i32_1 = arith.constant 0 : i32
    return %arg0, %c0_i32, %c0_i32_0 : i32, i32, i32
  }
  func.func @transform_2(%arg0: i32, %arg1: i32) -> (i32, i32) {
    %c0_i32 = arith.constant 0 : i32
    %c0_i32_0 = arith.constant 0 : i32
    %c0_i32_1 = arith.constant 0 : i32
    return %c0_i32, %c0_i32_0 : i32, i32
  }
  func.func @transform_3(%arg0: i32, %arg1: i32) -> (i32, i32) {
    %c0_i32 = arith.constant 0 : i32
    %c0_i32_0 = arith.constant 0 : i32
    %c0_i32_1 = arith.constant 0 : i32
    return %c0_i32, %c0_i32_0 : i32, i32
  }
  func.func @transform_4(%arg0: i32, %arg1: i32) -> (i32, i32) {
    %c0_i32 = arith.constant 0 : i32
    %c0_i32_0 = arith.constant 0 : i32
    %c0_i32_1 = arith.constant 0 : i32
    return %c0_i32, %c0_i32_0 : i32, i32
  }
  func.func @transform_5(%arg0: i32, %arg1: i32) -> (i32, i32) {
    %c0_i32 = arith.constant 0 : i32
    %c0_i32_0 = arith.constant 0 : i32
    %c0_i32_1 = arith.constant 0 : i32
    return %c0_i32, %c0_i32_0 : i32, i32
  }
  func.func @transform_6(%arg0: i32, %arg1: i32) -> (i32, i32) {
    %c0_i32 = arith.constant 0 : i32
    %c0_i32_0 = arith.constant 0 : i32
    %c0_i32_1 = arith.constant 0 : i32
    return %c0_i32, %c0_i32_0 : i32, i32
  }
  func.func @transform_7(%arg0: i32, %arg1: i32) -> (i32, i32) {
    %c0_i32 = arith.constant 0 : i32
    %c0_i32_0 = arith.constant 0 : i32
    %c0_i32_1 = arith.constant 0 : i32
    return %c0_i32, %c0_i32_0 : i32, i32
  }
  func.func @transform_8(%arg0: i32, %arg1: i32) -> (i32, i32) {
    %c0_i32 = arith.constant 0 : i32
    %c0_i32_0 = arith.constant 0 : i32
    %c0_i32_1 = arith.constant 0 : i32
    return %c0_i32, %c0_i32_0 : i32, i32
  }
  func.func @transform_9(%arg0: i32, %arg1: i32) -> (i32, i32) {
    %c0_i32 = arith.constant 0 : i32
    %c0_i32_0 = arith.constant 0 : i32
    %c0_i32_1 = arith.constant 0 : i32
    return %c0_i32, %c0_i32_0 : i32, i32
  }
  func.func @transform_10(%arg0: i32, %arg1: i32) -> (i32, i32) {
    %c0_i32 = arith.constant 0 : i32
    %c0_i32_0 = arith.constant 0 : i32
    %c0_i32_1 = arith.constant 0 : i32
    return %c0_i32, %c0_i32_0 : i32, i32
  }
  func.func @transform_11(%arg0: i32, %arg1: i32) -> (i32, i32) {
    %c0_i32 = arith.constant 0 : i32
    %c0_i32_0 = arith.constant 0 : i32
    %c0_i32_1 = arith.constant 0 : i32
    return %c0_i32, %c0_i32_0 : i32, i32
  }
  func.func @transform_12(%arg0: i32, %arg1: i32) -> (i32, i32) {
    %c0_i32 = arith.constant 0 : i32
    %c0_i32_0 = arith.constant 0 : i32
    %c0_i32_1 = arith.constant 0 : i32
    return %c0_i32, %c0_i32_0 : i32, i32
  }
  func.func @transform_13(%arg0: i32, %arg1: i32) -> (i32, i32) {
    %c0_i32 = arith.constant 0 : i32
    %c0_i32_0 = arith.constant 0 : i32
    %c0_i32_1 = arith.constant 0 : i32
    return %c0_i32, %c0_i32_0 : i32, i32
  }
  func.func @transform_14(%arg0: i32, %arg1: i32) -> (i32, i32) {
    %c0_i32 = arith.constant 0 : i32
    %c0_i32_0 = arith.constant 0 : i32
    %c0_i32_1 = arith.constant 0 : i32
    return %c0_i32, %c0_i32_0 : i32, i32
  }
  func.func @transform_15(%arg0: i32, %arg1: i32) -> (i32, i32) {
    %c0_i32 = arith.constant 0 : i32
    %c0_i32_0 = arith.constant 0 : i32
    %c0_i32_1 = arith.constant 0 : i32
    return %c0_i32, %c0_i32_0 : i32, i32
  }
  func.func @transform_16(%arg0: i32, %arg1: i32) -> (i32, i32, i32) {
    %c0_i32 = arith.constant 0 : i32
    %c0_i32_0 = arith.constant 0 : i32
    return %arg0, %arg1, %c0_i32 : i32, i32, i32
  }
}

</mosaic_0001>

<bundles_post_ra>
// kernel: tpu_custom_call.1
= control target key start
LH: loop header
LB: loop body
LE: loop exit
PB: predicated region body
PF: predicated region fallthrough
CT: control target
= control target key end

     0   :  { %s3038_s0 = inlined_call_operand.vmem [shape: f32[2,16,32], index: 0, kind: input, shape index: {}]   ;;  %s3039_s1 = inlined_call_operand.vmem [shape: f32[2,1,16], index: 1, kind: input, shape index: {}]   ;;  %s3040_s2 = inlined_call_operand.vmem [shape: bf16[32,32], index: 2, kind: input, shape index: {}]   ;;  %s3041_s3 = inlined_call_operand.hbm [shape: f32[1,32], index: 3, kind: input, shape index: {}]   ;;  %s3042_s4 = inlined_call_operand.hbm [shape: bf16[32,64], index: 4, kind: input, shape index: {}]   ;;  %s3043_s5 = inlined_call_operand.hbm [shape: f32[1,64], index: 5, kind: input, shape index: {}]   ;;  %s3044_s6 = inlined_call_operand.hbm [shape: bf16[32,32], index: 6, kind: input, shape index: {}]   ;;  %s3045_s7 = inlined_call_operand.hbm [shape: f32[1,32], index: 7, kind: input, shape index: {}]   ;;  %s3046_s8 = inlined_call_operand.hbm [shape: f32[1,32], index: 8, kind: input, shape index: {}]   ;;  %s3047_s9 = inlined_call_operand.hbm [shape: f32[1,32], index: 9, kind: input, shape index: {}]   ;;  %s3048_s10 = inlined_call_operand.vmem [shape: bf16[32,64], index: 10, kind: input, shape index: {}]   ;;  %s3049_s11 = inlined_call_operand.vmem [shape: f32[1,64], index: 11, kind: input, shape index: {}]   ;;  %s3050_s12 = inlined_call_operand.vmem [shape: bf16[64,32], index: 12, kind: input, shape index: {}]   ;;  %s3051_s13 = inlined_call_operand.vmem [shape: f32[1,32], index: 13, kind: input, shape index: {}]   ;;  %s3052_s14 = inlined_call_operand.vmem [shape: f32[1,32], index: 14, kind: input, shape index: {}]   ;;  %s3053_s15 = inlined_call_operand.vmem [shape: f32[1,32], index: 15, kind: input, shape index: {}]   ;;  %s3054_s16 = inlined_call_operand.hbm [shape: f32[2,16,32], index: 16, kind: output, shape index: {}]  }
   0x1   :  { %3072 = sst [smem:[#allocation31_spill]] %s3038_s0 }
   0x2   :  { %3073 = sst [smem:[#allocation32_spill]] %s3049_s11 }
   0x3   :  { %3074 = sst [smem:[#allocation33_spill]] %s3051_s13 }
   0x4   :  { %3075 = sst [smem:[#allocation34_spill]] %s3052_s14 }
   0x5   :  { %3076 = sst [smem:[#allocation35_spill]] %s3053_s15 }
   0x6   :  { %3077 = sst [smem:[#allocation36_spill]] %s3054_s16 }
   0x7   :  { %21 = vsyncpa [#allocation3], 0 }
   0x8   :  { %22 = vsyncpa [#allocation6], 0 }
   0x9   :  { %23 = vsyncpa [#allocation9], 0 }
   0xa   :  { %24 = vsyncpa [#allocation12], 0 }
   0xb   :  { %25 = vsyncpa [#allocation4], 0 }
   0xc   :  { %27 = vsyncpa [#allocation4 + $0x1], 0  ;;  %s2548_s21 = smov 0   ;;  %s2550_s22 = smov 0  }
   0xd   :  { %s2552_s23 = smov 0   ;;  %s2554_s24 = smov 0  }
   0xe   :  { %s2556_s25 = smov 0   ;;  %s2558_s26 = smov 0  }
   0xf   :  { %s2560_s27 = smov 0   ;;  %s2562_s28 = smov 0  }
  0x10 LB: > { %3078 = sst [smem:[#allocation20_spill]] %s2414_s21  ;;  %s1751_s29 = sadd.s32 4294967295, %s2442_s28   ;;  %s2442_s28 = sphi %s2562_s28, %s33_s28   ;;  %s2438_s27 = sphi %s2560_s27, %s3116_s27   ;;  %s2434_s26 = sphi %s2558_s26, %s3115_s26   ;;  %s2430_s25 = sphi %s2556_s25, %s3114_s25   ;;  %s2426_s24 = sphi %s2554_s24, %s3113_s24   ;;  %s2422_s23 = sphi %s2552_s23, %s3112_s23   ;;  %s2418_s22 = sphi %s2550_s22, %s3111_s22   ;;  %s2414_s21 = sphi %s2548_s21, %s3110_s21  }
  0x11   : > { %3079 = sst [smem:[#allocation21_spill]] %s2418_s22  ;;  %s1752_s30 = sadd.s32 4294967294, %s2442_s28  }
  0x12   : > { %3080 = sst [smem:[#allocation22_spill]] %s2422_s23  ;;  %s42_s0 = sadd.s32 1, %s2434_s26 }
  0x13   : > { %3081 = sst [smem:[#allocation23_spill]] %s2434_s26  ;;  %s45_s17 = sadd.s32 1, %s2438_s27 }
  0x14   : > { %3082 = sst [smem:[#allocation24_spill]] %s2438_s27  ;;  %p43_p0 = scmp.ge.s32.totalorder %s42_s0, 2 }
  0x15   : > { %3083 = sst [smem:[#allocation25_spill]] %s2442_s28  ;;  %s400_s18 = sadd.s32 1, %s2422_s23 }
  0x16   : > { %p410_p1 = scmp.ne.s32.totalorder %s2422_s23, %s2418_s22  ;;  %p411_p2 = scmp.eq.s32.totalorder %s1751_s29, 3 }
  0x17   : > { %s3118_s0 = smov (%p43_p0, %s42_s0), 0  ;;  %s3120_s17 = smov (!%p43_p0, %s45_s17), %s2438_s27 }
  0x18   : > { %3084 = sst [smem:[#allocation26_spill]] %s3118_s0  ;;  %s396_s19 = ssub.s32 %s2434_s26, %s3118_s0 }
  0x19   : > { %p2600_p3 = por %p411_p2, %p410_p1  ;;  %p47_p4 = scmp.ge.s32.totalorder %s3120_s17, 2 }
  0x1a   : > { %p416_p5 = scmp.ne.s32.totalorder %s2418_s22, %s2414_s21  ;;  %p417_p6 = scmp.eq.s32.totalorder %s1752_s30, 3 }
  0x1b   : > { %s3085_s20 = scalar_select %p2600_p3, 1, 0 }
  0x1c   : > { %p1753_p7 = scmp.ge.s32.totalorder %s2442_s28, 1  ;;  %s3122_s17 = smov (%p47_p4, %s3120_s17), 0 }
  0x1d   : > { %3086 = sst [smem:[#allocation27_spill]] %s3085_s20  ;;  %p2609_p8 = por %p417_p6, %p416_p5 }
  0x1e   : > { %3087 = sst [smem:[#allocation28_spill]] %s3122_s17  ;;  %p424_p9 = scmp.lt.s32.totalorder %s2442_s28, 5 }
  0x1f   : > { %s3088_s16 = scalar_select %p2609_p8, 1, 0 }
  0x20   : > { %s395_s13 = ssub.s32 %s2438_s27, %s3122_s17  ;;  %p2616_p10 = pnand %p1753_p7, %p424_p9 }
  0x21   : > { %3089 = sst [smem:[#allocation29_spill]] %s3088_s16  ;;  %s397_s11 = sor.u32 %s396_s19, %s395_s13 }
  0x22   : > { %s3090_s0 = scalar_select %p2616_p10, 1, 0 }
  0x23   : > { %p398_p11 = scmp.eq.s32.totalorder %s397_s11, 0  ;;  %p2620_p12 = scmp.eq.s32.totalorder %s1751_s29, 0 }
  0x24   : > { %p1969_p13 = pneg %p2616_p10  ;;  %s2444_s13 = smov [#allocation5]  }
  0x25   : > { %s3091_s26 = scalar_select %p2620_p12, 1, 0 }
  0x26   : > { %s2627_s30 = scalar_select %p398_p11, %s2422_s23, %s400_s18  }
  0x27   : > { %p2631_p0 = pnand %p2620_p12, %p1969_p13  ;;  %s450_s19 = sshll.u32 %s2444_s13, 4  ;;  %s451_s19 = int_to_ptr.vmem [resolvable:$true] %s450_s19 }
  0x28   : > { %3092 = sst [smem:[#allocation30_spill]] %s2627_s30  ;;  %s2136_s29 = scalar_lea.hbm %s3042_s4, 256 }
  0x29   : > { %p2137_p1 = scmp.ne.s32.totalorder %s3042_s4, %s2136_s29  ;;  %p2643_p2 = pneg %p2631_p0 }
  0x2a   : > { %p2143_p6 = scmp.lt.u32.totalorder %s2136_s29, %s3042_s4 }
  0x2b   : > { %p2139_p4 = pnand %p2643_p2, %p2137_p1 }
  0x2d   : > { %p2140_p5 = pneg %p2139_p4 }
  0x2f   : > { %p2145_p7 = pnand %p2143_p6, %p2140_p5 }
  0x31   : > { %2148 = shalt.err (!%p2145_p7)
}
  0x32   : > { %s2149_s17 = scalar_lea.vmem %s451_s19, 256  ;;  %p2157_p8 = scmp.lt.s32.totalorder %s451_s19, %s451_s19 }
  0x33   : > { %p2150_p9 = scmp.ne.s32.totalorder %s451_s19, %s2149_s17  ;;  %p2158_p3 = scmp.lt.s32.totalorder %s2149_s17, %s2149_s17 }
  0x35   : > { %p2152_p11 = pnand %p2150_p9, %p2643_p2  ;;  %p2159_p12 = por %p2158_p3, %p2157_p8 }
  0x37   : > { %p2153_p13 = pneg %p2152_p11 }
  0x39   : > { %p2160_p10 = pnand %p2159_p12, %p2153_p13 }
  0x3b   : > { %2163 = shalt.err (!%p2160_p10)
}
  0x3c   : > { %s2445_s21 = smov 64   ;;  %s2446_s27 = smov 4  }
  0x3d   : > { %1975 = dma.hbm_to_vmem [thread:$0]  (!%p2631_p0), %s3042_s4, 256, %s451_s19, [#allocation6], %s2445_s21, %s2445_s21, %s2446_s27  }
  0x3e   : > { %s2447_s29 = smov [#allocation8]   ;;  %s2448_s23 = smov [#allocation11]  }
  0x3f   : > { %s474_s13 = sshll.u32 %s2447_s29, 4  ;;  %s499_s28 = sshll.u32 %s2448_s23, 4  ;;  %s475_s13 = int_to_ptr.vmem [resolvable:$true] %s474_s13  ;;  %s2659_s28 = int_to_ptr.vmem [resolvable:$true] %s499_s28 }
  0x40   : > { %s2164_s22 = scalar_lea.hbm %s3044_s6, 256 }
  0x41   : > { %p2165_p3 = scmp.ne.s32.totalorder %s3044_s6, %s2164_s22  ;;  %p2171_p12 = scmp.lt.u32.totalorder %s2164_s22, %s3044_s6 }
  0x43   : > { %p2167_p8 = pnand %p2165_p3, %p2643_p2 }
  0x45   : > { %p2168_p10 = pneg %p2167_p8 }
  0x47   : > { %p2173_p1 = pnand %p2171_p12, %p2168_p10 }
  0x49   : > { %2176 = shalt.err (!%p2173_p1)
}
  0x4a   : > { %s2177_s23 = scalar_lea.vmem %s475_s13, 256  ;;  %p2185_p7 = scmp.lt.s32.totalorder %s475_s13, %s475_s13 }
  0x4b   : > { %p2178_p4 = scmp.ne.s32.totalorder %s475_s13, %s2177_s23  ;;  %p2186_p9 = scmp.lt.s32.totalorder %s2177_s23, %s2177_s23 }
  0x4d   : > { %p2180_p5 = pnand %p2178_p4, %p2643_p2  ;;  %p2187_p11 = por %p2186_p9, %p2185_p7 }
  0x4f   : > { %p2181_p6 = pneg %p2180_p5 }
  0x51   : > { %p2188_p13 = pnand %p2187_p11, %p2181_p6 }
  0x53   : > { %2191 = shalt.err (!%p2188_p13)
}
  0x54   : > { %1981 = dma.hbm_to_vmem [thread:$0]  (!%p2631_p0), %s3044_s6, 256, %s475_s13, [#allocation9], %s2445_s21, %s2445_s21, %s2446_s27  }
  0x55   : > { %s2192_s11 = scalar_lea.hbm %s3046_s8, 16 }
  0x56   : > { %p2193_p3 = scmp.ne.s32.totalorder %s3046_s8, %s2192_s11  ;;  %p2199_p12 = scmp.lt.u32.totalorder %s2192_s11, %s3046_s8 }
  0x58   : > { %p2195_p8 = pnand %p2193_p3, %p2643_p2 }
  0x5a   : > { %p2196_p10 = pneg %p2195_p8 }
  0x5c   : > { %p2201_p1 = pnand %p2199_p12, %p2196_p10 }
  0x5e   : > { %2204 = shalt.err (!%p2201_p1)
}
  0x5f   : > { %s2205_s21 = scalar_lea.vmem %s2659_s28, 16  ;;  %s2212_s27 = scalar_lea.vmem %s2659_s28, 32 }
  0x60   : > { %p2206_p4 = scmp.ne.s32.totalorder %s2659_s28, %s2205_s21  ;;  %p2213_p7 = scmp.lt.s32.totalorder %s2659_s28, %s2659_s28 }
  0x61   : > { %p2214_p9 = scmp.lt.s32.totalorder %s2212_s27, %s2205_s21 }
  0x62   : > { %p2208_p5 = pnand %p2206_p4, %p2643_p2 }
  0x63   : > { %p2215_p11 = por %p2214_p9, %p2213_p7 }
  0x64   : > { %p2209_p6 = pneg %p2208_p5 }
  0x66   : > { %p2216_p13 = pnand %p2215_p11, %p2209_p6 }
  0x68   : > { %2219 = shalt.err (!%p2216_p13)
}
  0x69   : > { %1987 = dma.hbm_to_vmem [thread:$0]  (!%p2631_p0), %s3046_s8, 16, %s2659_s28, [#allocation12]  }
  0x6a   : > { %s2449_s14 = smov [#allocation2]   ;;  %s2450_s22 = smov [#allocation7]  }
  0x6b   : > { %s440_s15 = sshll.u32 %s2449_s14, 4  ;;  %s464_s20 = sshll.u32 %s2450_s22, 4  ;;  %s441_s15 = int_to_ptr.vmem [resolvable:$true] %s440_s15  ;;  %s2703_s20 = int_to_ptr.vmem [resolvable:$true] %s464_s20 }
  0x6c   : > { %s2220_s17 = scalar_lea.hbm %s3041_s3, 16 }
  0x6d   : > { %p2221_p3 = scmp.ne.s32.totalorder %s3041_s3, %s2220_s17  ;;  %p2227_p12 = scmp.lt.u32.totalorder %s2220_s17, %s3041_s3 }
  0x6f   : > { %p2223_p8 = pnand %p2221_p3, %p2643_p2 }
  0x71   : > { %p2224_p10 = pneg %p2223_p8 }
  0x73   : > { %p2229_p1 = pnand %p2227_p12, %p2224_p10 }
  0x75   : > { %2232 = shalt.err (!%p2229_p1)
}
  0x76   : > { %s2233_s27 = scalar_lea.vmem %s441_s15, 16  ;;  %s2240_s13 = scalar_lea.vmem %s441_s15, 32 }
  0x77   : > { %p2234_p4 = scmp.ne.s32.totalorder %s441_s15, %s2233_s27  ;;  %p2241_p7 = scmp.lt.s32.totalorder %s441_s15, %s441_s15 }
  0x78   : > { %p2242_p9 = scmp.lt.s32.totalorder %s2240_s13, %s2233_s27 }
  0x79   : > { %p2236_p5 = pnand %p2234_p4, %p2643_p2 }
  0x7a   : > { %p2243_p11 = por %p2242_p9, %p2241_p7 }
  0x7b   : > { %p2237_p6 = pneg %p2236_p5 }
  0x7d   : > { %p2244_p13 = pnand %p2243_p11, %p2237_p6 }
  0x7f   : > { %2247 = shalt.err (!%p2244_p13)
}
  0x80   : > { %1972 = dma.hbm_to_vmem [thread:$0]  (!%p2631_p0), %s3041_s3, 16, %s441_s15, [#allocation3]  }
  0x81   : > { %s2248_s29 = scalar_lea.hbm %s3043_s5, 16 }
  0x82   : > { %p2249_p3 = scmp.ne.s32.totalorder %s3043_s5, %s2248_s29  ;;  %p2255_p12 = scmp.lt.u32.totalorder %s2248_s29, %s3043_s5 }
  0x84   : > { %p2251_p8 = pnand %p2249_p3, %p2643_p2 }
  0x86   : > { %p2252_p10 = pneg %p2251_p8 }
  0x88   : > { %p2257_p1 = pnand %p2255_p12, %p2252_p10 }
  0x8a   : > { %2260 = shalt.err (!%p2257_p1)
}
  0x8b   : > { %s2261_s15 = scalar_lea.vmem %s2703_s20, 16  ;;  %s2268_s28 = scalar_lea.vmem %s2703_s20, 32 }
  0x8c   : > { %p2262_p4 = scmp.ne.s32.totalorder %s2703_s20, %s2261_s15  ;;  %p2269_p7 = scmp.lt.s32.totalorder %s2703_s20, %s2703_s20 }
  0x8d   : > { %p2270_p9 = scmp.lt.s32.totalorder %s2268_s28, %s2261_s15 }
  0x8e   : > { %p2264_p5 = pnand %p2262_p4, %p2643_p2 }
  0x8f   : > { %p2271_p11 = por %p2270_p9, %p2269_p7 }
  0x90   : > { %p2265_p6 = pneg %p2264_p5 }
  0x92   : > { %p2272_p13 = pnand %p2271_p11, %p2265_p6 }
  0x94   : > { %2275 = shalt.err (!%p2272_p13)
}
  0x95   : > { %1978 = dma.hbm_to_vmem [thread:$0]  (!%p2631_p0), %s3043_s5, 16, %s2703_s20, [#allocation6]  }
  0x96   : > { %s2451_s23 = smov [#allocation10]   ;;  %s2452_s22 = smov [#allocation13]  }
  0x97   : > { %s488_s14 = sshll.u32 %s2451_s23, 4  ;;  %s510_s11 = sshll.u32 %s2452_s22, 4  ;;  %s489_s14 = int_to_ptr.vmem [resolvable:$true] %s488_s14  ;;  %s2747_s11 = int_to_ptr.vmem [resolvable:$true] %s510_s11 }
  0x98   : > { %s2276_s30 = scalar_lea.hbm %s3045_s7, 16 }
  0x99   : > { %p2277_p3 = scmp.ne.s32.totalorder %s3045_s7, %s2276_s30  ;;  %p2283_p12 = scmp.lt.u32.totalorder %s2276_s30, %s3045_s7 }
  0x9b   : > { %p2279_p8 = pnand %p2277_p3, %p2643_p2 }
  0x9d   : > { %p2280_p10 = pneg %p2279_p8 }
  0x9f   : > { %p2285_p1 = pnand %p2283_p12, %p2280_p10 }
  0xa1   : > { %2288 = shalt.err (!%p2285_p1)
}
  0xa2   : > { %s2289_s28 = scalar_lea.vmem %s489_s14, 16  ;;  %s2296_s27 = scalar_lea.vmem %s489_s14, 32 }
  0xa3   : > { %p2290_p4 = scmp.ne.s32.totalorder %s489_s14, %s2289_s28  ;;  %p2297_p7 = scmp.lt.s32.totalorder %s489_s14, %s489_s14 }
  0xa4   : > { %p2298_p9 = scmp.lt.s32.totalorder %s2296_s27, %s2289_s28 }
  0xa5   : > { %p2292_p5 = pnand %p2290_p4, %p2643_p2 }
  0xa6   : > { %p2299_p11 = por %p2298_p9, %p2297_p7 }
  0xa7   : > { %p2293_p6 = pneg %p2292_p5 }
  0xa9   : > { %p2300_p13 = pnand %p2299_p11, %p2293_p6 }
  0xab   : > { %2303 = shalt.err (!%p2300_p13)
}
  0xac   : > { %1984 = dma.hbm_to_vmem [thread:$0]  (!%p2631_p0), %s3045_s7, 16, %s489_s14, [#allocation9]  }
  0xad   : > { %s2304_s17 = scalar_lea.hbm %s3047_s9, 16 }
  0xae   : > { %p2305_p3 = scmp.ne.s32.totalorder %s3047_s9, %s2304_s17  ;;  %p2311_p12 = scmp.lt.u32.totalorder %s2304_s17, %s3047_s9 }
  0xb0   : > { %p2307_p8 = pnand %p2305_p3, %p2643_p2 }
  0xb2   : > { %p2308_p10 = pneg %p2307_p8 }
  0xb4   : > { %p2313_p1 = pnand %p2311_p12, %p2308_p10 }
  0xb6   : > { %2316 = shalt.err (!%p2313_p1)
}
  0xb7   : > { %s2317_s14 = scalar_lea.vmem %s2747_s11, 16  ;;  %s2324_s20 = scalar_lea.vmem %s2747_s11, 32 }
  0xb8   : > { %p2318_p4 = scmp.ne.s32.totalorder %s2747_s11, %s2317_s14  ;;  %p2325_p7 = scmp.lt.s32.totalorder %s2747_s11, %s2747_s11 }
  0xb9   : > { %p2326_p9 = scmp.lt.s32.totalorder %s2324_s20, %s2317_s14 }
  0xba   : > { %p2320_p5 = pnand %p2318_p4, %p2643_p2 }
  0xbb   : > { %p2327_p11 = por %p2326_p9, %p2325_p7 }
  0xbc   : > { %p2321_p6 = pneg %p2320_p5 }
  0xbe   : > { %p2328_p13 = pnand %p2327_p11, %p2321_p6 }
  0xc0   : > { %2331 = shalt.err (!%p2328_p13)
}
  0xc1   : > { %1990 = dma.hbm_to_vmem [thread:$0]  (!%p2631_p0), %s3047_s9, 16, %s2747_s11, [#allocation12]  }
  0xc2   : > { %p3095_p3 = scmp.ne.s32.totalorder %s3090_s0, 0 }
  0xc3   : > { %p3096_p2 = scmp.ne.s32.totalorder (!%p3095_p3), %s3091_s26, 0 }
  0xc4   : > { %555 = sbr.rel (%p3095_p3) target bundleno = 2803 (0xaf3), region = 84 }
  0xcb   : > { %2393 = dma.done.wait (%p3096_p2), [#allocation3], 16  }
  0xcc   : > { %2395 = vsyncadd (%p3096_p2), [#allocation3], 4294967280 }
  0xcd   : > { %2397 = dma.done.wait (%p3096_p2), [#allocation6], 272  }
  0xce   : > { %2399 = vsyncadd (%p3096_p2), [#allocation6], 4294967024 }
  0xcf   : > { %2401 = dma.done.wait (%p3096_p2), [#allocation9], 272  }
  0xd0   : > { %2403 = vsyncadd (%p3096_p2), [#allocation9], 4294967024 }
  0xd1   : > { %2405 = dma.done.wait (%p3096_p2), [#allocation12], 32  }
  0xd2   : > { %2407 = vsyncadd (%p3096_p2), [#allocation12], 4294967264  ;;  %p632_p0 = scmp.lt.s32.totalorder %s2430_s25, 1  ;;  %s1773_s0 = sshll.u32 %s2426_s24, 3  ;;  %vm649_vm0 = vcmask 261120   ;;  %v2092_v21 = vld [vmem:[#allocation5] sm:$0xff]  }
  0xd3   : > { %s3097_s23 = sld [smem:[#allocation31_spill]]  ;;  %v2453_v22 = vmov 0.0   ;;  %vm2454_vm1 = vmmov 0   ;;  %v2093_v23 = vld [vmem:[#allocation5 + $0x8] sm:$0xff]   ;;  %v1774_v48 = vld [vmem:[#allocation11] ss:$0 sm:$0xff] }
  0xd4   : > { %s2811_s16 = scalar_select %p632_p0, %s2430_s25, 1  ;;  %1847 = vmatprep.subr.bf16.mxu1 %v2453_v22  ;;  %1851 = vmatprep.mubr.msk.bf16.mxu1 %vm2454_vm1, %v2453_v22  ;;  %v1775_v54 = vld [vmem:[#allocation13] ss:$0 sm:$0xff]  ;;  %v2094_v60 = vld [vmem:[%s3040_s2] sm:$0xff]   ;;  %vm888_vm8 = vcmask 64512   ;;  %vm1073_vm10 = vcmask 130048  }
  0xd5   : > { %1848 = vmatpush3.bf16.msra.mxu1 %v2092_v21  ;;  %1863 = vmatprep.subr.bf16.mxu0 %v2453_v22  ;;  %v2095_v63 = vld [vmem:[%s3040_s2 + $0x8] sm:$0xff]   ;;  %s2455_s21 = smov 112   ;;  %s2456_s15 = smov 120   ;;  %vm1324_vm11 = vcmask 195584   ;;  %vm1537_vm14 = vcmask 523264  }
  0xd6   : > { %s1813_s18 = sshll.u32 %s2811_s16, 4  ;;  %1849 = vmatprep.subr.bf16.mxu1 %v2453_v22  ;;  %1865 = vmatprep.mubr.msk.bf16.mxu0 %vm2454_vm1, %v2453_v22  ;;  %s2457_s14 = smov 104  }
  0xd7   : > { %s639_s27 = scalar_lea.vmem %s3039_s1, %s2811_s16  ;;  %s2458_s16 = smov 96  }
  0xd8   : > { %s2461_s11 = smov 24   ;;  %s1809_s30 = sshll.u32 %s2430_s25, 1 }
  0xd9   : > { %s636_s22 = scalar_lea.vmem %s3097_s23, %s1813_s18  ;;  %1850 = vmatpush3.bf16.msra.mxu1 %v2093_v23  ;;  %s2460_s18 = smov 8  }
  0xda   : > { %s644_s29 = scalar_lea.vmem %s636_s22, %s1773_s0  ;;  %v641_v0 = vld [vmem:[%s636_s22] sm:$0xff]  ;;  %v642_v4 = vld [vmem:[%s636_s22 + $0x8] sm:$0xff]  ;;  %1855 = vmatprep.subr.bf16.mxu1 %v2453_v22  ;;  %s2459_s0 = smov 16  }
  0xdb   : > { %v2818_v1 = vld [vmem:[%s644_s29] sm:$0xff]  ;;  %v650_v2 = vsel %vm649_vm0, %v641_v0, 0.0  ;;  %v653_v5 = vsel %vm649_vm0, %v642_v4, 0.0  ;;  %s3101_s29 = sld [smem:[#allocation32_spill]]  ;;  %s1595_s19 = sadd.s32 %s2426_s24, %s1809_s30 }
  0xdc   : > { %v707_v3 = vsel %vm649_vm0, %v2818_v1, 0.0  ;;  %651 = vadd.xlane.f32.xlu0 %v650_v2  ;;  %s3103_s20 = sld [smem:[#allocation27_spill]]  ;;  %s1810_s28 = sshll.u32 %s1595_s19, 7 }
  0xdd   : > { %708 = vadd.xlane.f32.xlu1 %v707_v3  ;;  %v1776_v3 = vld [vmem:[#allocation7] ss:$0 sm:$0xff]  ;;  %s2462_s23 = smov [#allocation14]  }
  0xde   : > { %s2336_s22 = sshll.u32 %s2462_s23, 4  ;;  %s2337_s22 = int_to_ptr.vmem [resolvable:$false] %s2336_s22 }
  0xe0   : > { %654 = vadd.xlane.f32.xlu0 %v653_v5 }
  0xe2   : > { %p3105_p10 = scmp.ne.s32.totalorder %s3103_s20, 0 }
 0x169   : > { %v652_v6 = vpop.xlane.xlu0 %651 }
 0x16a   : > { %v709_v7 = vpop.xlane.xlu1 %708  ;;  %v657_v8 = vmul.f32 0.03125, %v652_v6 }
 0x16b   : > { %v710_v9 = vmul.f32 0.03125, %v709_v7 }
 0x16c   : > { %v2824_v10 = vsub.f32 %v641_v0, %v657_v8 }
 0x16d   : > { %v2827_v11 = vsub.f32 %v2818_v1, %v710_v9  ;;  %v655_v12 = vpop.xlane.xlu0 %654 }
 0x16e   : > { %v658_v13 = vmul.f32 0.03125, %v655_v12  ;;  %v661_v14 = vmul.f32 %v2824_v10, %v2824_v10  ;;  %v695_v50 = vmul.f32 %v1774_v48, %v2824_v10 }
 0x16f   : > { %v712_v15 = vmul.f32 %v2827_v11, %v2827_v11  ;;  %v726_v57 = vmul.f32 %v1774_v48, %v2827_v11  ;;  %v1780_v11 = vld [vmem:[#allocation2] ss:$0 sm:$0xff] }
 0x170   : > { %v660_v16 = vsub.f32 %v642_v4, %v658_v13  ;;  %v663_v17 = vsel %vm649_vm0, %v661_v14, 0.0 }
 0x171   : > { %664 = vadd.xlane.f32.xlu1 %v663_v17  ;;  %v713_v18 = vsel %vm649_vm0, %v712_v15, 0.0 }
 0x172   : > { %v662_v19 = vmul.f32 %v660_v16, %v660_v16  ;;  %v696_v51 = vmul.f32 %v1774_v48, %v660_v16 }
 0x174   : > { %v666_v20 = vsel %vm649_vm0, %v662_v19, 0.0 }
 0x175   : > { %714 = vadd.xlane.f32.xlu1 %v713_v18  ;;  %667 = vadd.xlane.f32.xlu0 %v666_v20 }
 0x1fe   : > { %v665_v24 = vpop.xlane.xlu1 %664 }
 0x1ff   : > { %v669_v25 = vmul.f32 0.032258064, %v665_v24 }
 0x201   : > { %2104 = vrsqrt.f32 %v669_v25  ;;  %vm673_vm2 = vcmp.eq.f32.partialorder %v669_v25, inf  ;;  %v676_v32 = vand.u32 2147483648, %v669_v25  ;;  %vm675_vm3 = vcmp.eq.f32.partialorder %v669_v25, 0.0 }
 0x202   : > { %v715_v26 = vpop.xlane.xlu1 %714  ;;  %v668_v27 = vpop.xlane.xlu0 %667 }
 0x203   : > { %v716_v28 = vmul.f32 0.032258064, %v715_v26  ;;  %v670_v29 = vmul.f32 0.032258064, %v668_v27 }
 0x205   : > { %2106 = vrsqrt.f32 %v716_v28  ;;  %vm719_vm4 = vcmp.eq.f32.partialorder %v716_v28, inf  ;;  %v722_v39 = vand.u32 2147483648, %v716_v28  ;;  %vm721_vm5 = vcmp.eq.f32.partialorder %v716_v28, 0.0 }
 0x206   : > { %2108 = vrsqrt.f32 %v670_v29  ;;  %vm680_vm6 = vcmp.eq.f32.partialorder %v670_v29, inf  ;;  %v683_v42 = vand.u32 2147483648, %v670_v29  ;;  %vm682_vm7 = vcmp.eq.f32.partialorder %v670_v29, 0.0 }
 0x20b   : > { %v2105_v30 = vpop.eup %2104 }
 0x20c   : > { %v672_v31 = vmul.f32 %v2105_v30, %v669_v25  ;;  %v646_v30 = vld [vmem:[%s639_s27] sm:$0x1]  ;;  %s3099_s27 = sld [smem:[#allocation35_spill]] }
 0x20d   : > { %vm880_vm9 = vcmp.eq.f32.partialorder %v646_v30, 0.0 }
 0x20e   : > { %v674_v33 = vsel %vm673_vm2, %v669_v25, %v672_v31 }
 0x20f   : > { %v2107_v34 = vpop.eup %2106  ;;  %v677_v35 = vsel %vm675_vm3, %v676_v32, %v674_v33  ;;  %v881_v33 = vsel %vm880_vm9, -1e+09, %v2453_v22 }
 0x210   : > { %v2109_v36 = vpop.eup %2108  ;;  %v685_v37 = vadd.f32 1e-06, %v677_v35  ;;  %v718_v38 = vmul.f32 %v2107_v34, %v716_v28 }
 0x211   : > { %v679_v40 = vmul.f32 %v2109_v36, %v670_v29 }
 0x212   : > { %v720_v41 = vsel %vm719_vm4, %v716_v28, %v718_v38  ;;  %2110 = vrcp.f32 %v685_v37 }
 0x213   : > { %v723_v43 = vsel %vm721_vm5, %v722_v39, %v720_v41  ;;  %v681_v44 = vsel %vm680_vm6, %v670_v29, %v679_v40  ;;  %v883_v29 = vlaneseq }
 0x214   : > { %v684_v45 = vsel %vm682_vm7, %v683_v42, %v681_v44  ;;  %v724_v46 = vadd.f32 1e-06, %v723_v43 }
 0x215   : > { %v686_v47 = vadd.f32 1e-06, %v684_v45  ;;  %v884_v31 = vshrl.u32 %v883_v29, 7 }
 0x217   : > { %2112 = vrcp.f32 %v686_v47  ;;  %v885_v32 = vsub.s32 0, %v884_v31 }
 0x218   : > { %2114 = vrcp.f32 %v724_v46 }
 0x219   : > { %v886_v34 = vrot.slane %v881_v33, %v885_v32 }
 0x21c   : > { %v2111_v49 = vpop.eup %2110 }
 0x21d   : > { %v697_v52 = vmul.f32 %v2111_v49, %v695_v50 }
 0x21f   : > { %v705_v58 = vadd.f32 %v1775_v54, %v697_v52 }
 0x221   : > { %v2113_v53 = vpop.eup %2112 }
 0x222   : > { %v698_v55 = vmul.f32 %v2113_v53, %v696_v51  ;;  %v2115_v56 = vpop.eup %2114 }
 0x223   : > { %v727_v62 = vmul.f32 %v2115_v56, %v726_v57 }
 0x224   : > { %v706_v59 = vadd.f32 %v1775_v54, %v698_v55 }
 0x225   : > { %v728_v0 = vadd.f32 %v1775_v54, %v727_v62 }
 0x226   : > { %v729_v61 = vpack.c.bf16 %v706_v59, %v705_v58 }
 0x227   : > { %v797_v2 = vpack.c.bf16 %v728_v0, %v728_v0 }
 0x228   : > { %1852 = vmatmul.mubr.msk.bf16.vlgmr.msra.gmra.mrb[0].mxu1 %vm649_vm0, %v729_v61 }
 0x229   : > { %1856 = vmatpush3.bf16.msra.mxu1 %v2094_v60  ;;  %1859 = vmatprep.mubr.msk.bf16.mxu1 %vm2454_vm1, %v2453_v22 }
 0x22a   : > { %1857 = vmatprep.subr.bf16.mxu1 %v2453_v22 }
 0x22d   : > { %1858 = vmatpush3.bf16.msra.mxu1 %v2095_v63 }
 0x22e   : > { %1869 = vmatprep.subr.bf16.mxu1 %v2453_v22 }
 0x230   : > { %1860 = vmatmul.mubr.msk.bf16.vlgmr.msra.gmra.mrb[4].mxu1 %vm649_vm0, %v797_v2 }
 0x231   : > { %1871 = vmatprep.mubr.msk.bf16.mxu1 %vm2454_vm1, %v2453_v22 }
 0x2fb   : > { %v790_v4 = vpop.f32.mrb[0].mxu1 }
 0x2fc   : > { %v1853_v5 = vpop.f32.mrb[1].mxu1  ;;  %v791_v7 = vadd.f32 %v1776_v3, %v790_v4 }
 0x2fd   : > { %v793_v6 = vpop.f32.mrb[2].mxu1 }
 0x2fe   : > { %v794_v8 = vadd.f32 %v1776_v3, %v793_v6  ;;  %v1854_v9 = vpop.f32.mrb[3].mxu1 }
 0x300   : > { %v2860_v10 = vpack.c.bf16 %v794_v8, %v791_v7 }
 0x302   : > { %876 = vrot.lane.b32.xlu1 %v2860_v10, %s2455_s21  ;;  %874 = vrot.lane.b32.xlu0 %v2860_v10, %s2456_s15  ;;  %v893_v12 = vsel %vm888_vm8, %v2860_v10, 0 }
 0x303   : > { %v858_v13 = vpop.f32.mrb[4].mxu1  ;;  %1864 = vmatpush3.bf16.xpose.msra.mxu0 %v893_v12 }
 0x304   : > { %v859_v14 = vadd.f32 %v1780_v11, %v858_v13  ;;  %v1861_v15 = vpop.f32.mrb[5].mxu1  ;;  %1875 = vmatprep.subr.bf16.mxu0 %v2453_v22 }
 0x305   : > { %v861_v16 = vpop.f32.mrb[6].mxu1 }
 0x306   : > { %v864_v17 = vpack.c.bf16 %v859_v14, %v859_v14  ;;  %v1862_v18 = vpop.f32.mrb[7].mxu1 }
 0x308   : > { %869 = vrot.lane.b32.xlu0 %v864_v17, %s2455_s21  ;;  %867 = vrot.lane.b32.xlu1 %v864_v17, %s2456_s15 }
 0x30a   : > { %1866 = vmatmul.mubr.msk.bf16.vlgmr.msra.gmra.mrb[0].mxu0 %vm888_vm8, %v864_v17 }
 0x30b   : > { %1877 = vmatprep.mubr.msk.bf16.mxu0 %vm2454_vm1, %v2453_v22 }
 0x30c   : > { %878 = vrot.lane.b32.xlu1 %v2860_v10, %s2457_s14 }
 0x310   : > { %871 = vrot.lane.b32.xlu1 %v864_v17, %s2457_s14  ;;  %s3098_s14 = sld [smem:[#allocation34_spill]] }
 0x374   : > { %v2871_v19 = vpop.permute.xlu1 %876  ;;  %v2873_v20 = vpop.permute.xlu0 %874 }
 0x375   : > { %v985_v21 = vsel %vm888_vm8, %v2871_v19, 0  ;;  %v939_v23 = vsel %vm888_vm8, %v2873_v20, 0 }
 0x376   : > { %1870 = vmatpush3.bf16.xpose.msra.mxu1 %v939_v23  ;;  %1876 = vmatpush3.bf16.xpose.msra.mxu0 %v985_v21 }
 0x377   : > { %1881 = vmatprep.subr.bf16.mxu1 %v2453_v22  ;;  %1887 = vmatprep.subr.bf16.mxu0 %v2453_v22 }
 0x37a   : > { %v868_v24 = vpop.permute.xlu1 %867  ;;  %v870_v25 = vpop.permute.xlu0 %869 }
 0x37d   : > { %1872 = vmatmul.mubr.msk.bf16.vlgmr.msra.gmra.mrb[8].mxu1 %vm888_vm8, %v868_v24  ;;  %1878 = vmatmul.mubr.msk.bf16.vlgmr.msra.gmra.mrb[4].mxu0 %vm888_vm8, %v870_v25 }
 0x37e   : > { %v2883_v26 = vpop.permute.xlu1 %878  ;;  %1883 = vmatprep.mubr.msk.bf16.mxu1 %vm2454_vm1, %v2453_v22  ;;  %1889 = vmatprep.mubr.msk.bf16.mxu0 %vm2454_vm1, %v2453_v22 }
 0x37f   : > { %v1031_v27 = vsel %vm888_vm8, %v2883_v26, 0 }
 0x380   : > { %1882 = vmatpush3.bf16.xpose.msra.mxu1 %v1031_v27 }
 0x381   : > { %1893 = vmatprep.subr.bf16.mxu1 %v2453_v22 }
 0x382   : > { %v872_v28 = vpop.permute.xlu1 %871 }
 0x387   : > { %1884 = vmatmul.mubr.msk.bf16.vlgmr.msra.gmra.mrb[12].mxu1 %vm888_vm8, %v872_v28 }
 0x388   : > { %1895 = vmatprep.mubr.msk.bf16.mxu1 %vm2454_vm1, %v2453_v22 }
 0x3dd   : > { %v929_v35 = vpop.f32.mrb[0].mxu0 }
 0x3de   : > { %v930_v36 = vadd.f32 %v929_v35, %v886_v34  ;;  %v1867_v37 = vpop.f32.mrb[1].mxu0 }
 0x3df   : > { %v932_v38 = vpop.f32.mrb[2].mxu0  ;;  %v2096_v37 = vld [vmem:[#allocation8] sm:$0xff]  }
 0x3e0   : > { %v1868_v39 = vpop.f32.mrb[3].mxu0  ;;  %v1074_v40 = vsel %vm1073_vm10, %v930_v36, -inf }
 0x3e1   : > { %1075 = vmax.xlane.f32.xlu0 %v1074_v40  ;;  %v2097_v40 = vld [vmem:[#allocation8 + $0x8] sm:$0xff]  }
 0x450   : > { %v975_v41 = vpop.f32.mrb[8].mxu1  ;;  %v1021_v42 = vpop.f32.mrb[4].mxu0 }
 0x451   : > { %v976_v43 = vadd.f32 %v975_v41, %v886_v34  ;;  %v1022_v44 = vadd.f32 %v1021_v42, %v886_v34  ;;  %v1873_v45 = vpop.f32.mrb[9].mxu1  ;;  %v1879_v46 = vpop.f32.mrb[5].mxu0 }
 0x452   : > { %v978_v47 = vpop.f32.mrb[10].mxu1  ;;  %v1024_v48 = vpop.f32.mrb[6].mxu0 }
 0x453   : > { %v1874_v49 = vpop.f32.mrb[11].mxu1  ;;  %v1880_v50 = vpop.f32.mrb[7].mxu0  ;;  %v1080_v51 = vsel %vm1073_vm10, %v1022_v44, -inf  ;;  %v1077_v52 = vsel %vm1073_vm10, %v976_v43, -inf }
 0x454   : > { %1081 = vmax.xlane.f32.xlu0 %v1080_v51  ;;  %1078 = vmax.xlane.f32.xlu1 %v1077_v52 }
 0x45a   : > { %v1067_v53 = vpop.f32.mrb[12].mxu1 }
 0x45b   : > { %v1068_v54 = vadd.f32 %v1067_v53, %v886_v34  ;;  %v1885_v55 = vpop.f32.mrb[13].mxu1 }
 0x45c   : > { %v1070_v56 = vpop.f32.mrb[14].mxu1 }
 0x45d   : > { %v1886_v57 = vpop.f32.mrb[15].mxu1  ;;  %v1083_v58 = vsel %vm1073_vm10, %v1068_v54, -inf }
 0x45e   : > { %1084 = vmax.xlane.f32.xlu0 %v1083_v58 }
 0x46e   : > { %v1076_v59 = vpop.xlane.xlu0 %1075 }
 0x46f   : > { %v1086_v60 = vsub.f32 %v930_v36, %v1076_v59 }
 0x471   : > { %v1090_v61 = vmul.f32 1.442695, %v1086_v60 }
 0x473   : > { %2116 = vpow2.f32 %v1090_v61 }
 0x47d   : > { %v2117_v62 = vpop.eup %2116 }
 0x47e   : > { %v1098_v63 = vsel %vm1073_vm10, %v2117_v62, 0.0 }
 0x47f   : > { %1099 = vadd.xlane.f32.xlu0 %v1098_v63 }
 0x4e1   : > { %v1082_v0 = vpop.xlane.xlu0 %1081  ;;  %v1079_v2 = vpop.xlane.xlu1 %1078 }
 0x4e2   : > { %v1088_v3 = vsub.f32 %v1022_v44, %v1082_v0  ;;  %v1087_v4 = vsub.f32 %v976_v43, %v1079_v2  ;;  %v1792_v2 = vld [vmem:[#allocation10] ss:$0 sm:$0xff] }
 0x4e4   : > { %v1094_v5 = vmul.f32 1.442695, %v1088_v3  ;;  %v1092_v6 = vmul.f32 1.442695, %v1087_v4 }
 0x4e6   : > { %2118 = vpow2.f32 %v1094_v5 }
 0x4e7   : > { %2120 = vpow2.f32 %v1092_v6 }
 0x4eb   : > { %v1085_v12 = vpop.xlane.xlu0 %1084 }
 0x4ec   : > { %v1089_v13 = vsub.f32 %v1068_v54, %v1085_v12 }
 0x4ee   : > { %v1096_v14 = vmul.f32 1.442695, %v1089_v13 }
 0x4f0   : > { %v2119_v7 = vpop.eup %2118  ;;  %2122 = vpow2.f32 %v1096_v14 }
 0x4f1   : > { %v2121_v8 = vpop.eup %2120  ;;  %v1104_v9 = vsel %vm1073_vm10, %v2119_v7, 0.0 }
 0x4f2   : > { %v1101_v11 = vsel %vm1073_vm10, %v2121_v8, 0.0  ;;  %1105 = vadd.xlane.f32.xlu0 %v1104_v9 }
 0x4f3   : > { %1102 = vadd.xlane.f32.xlu1 %v1101_v11 }
 0x4fa   : > { %v2123_v15 = vpop.eup %2122 }
 0x4fb   : > { %v1107_v16 = vsel %vm1073_vm10, %v2123_v15, 0.0 }
 0x504   : > { %1168 = vrot.lane.b32.xlu1 %v2873_v20, %s2458_s16 }
 0x508   : > { %1214 = vrot.lane.b32.xlu1 %v2871_v19, %s2458_s16  ;;  %1122 = vrot.lane.b32.xlu0 %v2860_v10, %s2458_s16 }
 0x50c   : > { %v1100_v17 = vpop.xlane.xlu0 %1099 }
 0x50d   : > { %2124 = vrcp.f32 %v1100_v17  ;;  %v2100_v17 = vld [vmem:[%s3050_s12] sm:$0xff]  }
 0x517   : > { %v2125_v18 = vpop.eup %2124 }
 0x518   : > { %v1114_v20 = vmul.f32 %v2125_v18, %v2117_v62  ;;  %v2101_v18 = vld [vmem:[%s3050_s12 + $0x8] sm:$0xff]  }
 0x51a   : > { %v1118_v24 = vpack.c.bf16 %v1114_v20, %v1114_v20 }
 0x52c   : > { %1108 = vadd.xlane.f32.xlu1 %v1107_v16  ;;  %v2098_v16 = vld [vmem:[%s3048_s10] sm:$0xff]  }
 0x53d   : > { %1260 = vrot.lane.b32.xlu1 %v2883_v26, %s2458_s16 }
 0x57f   : > { %v1106_v21 = vpop.xlane.xlu0 %1105 }
 0x580   : > { %v1103_v23 = vpop.xlane.xlu1 %1102  ;;  %2126 = vrcp.f32 %v1106_v21 }
 0x581   : > { %2128 = vrcp.f32 %v1103_v23 }
 0x583   : > { %v1123_v19 = vpop.permute.xlu0 %1122 }
 0x584   : > { %v1169_v10 = vpop.permute.xlu1 %1168  ;;  %1888 = vmatpush3.bf16.msra.mxu0 %v1123_v19 }
 0x585   : > { %1894 = vmatpush3.bf16.msra.mxu1 %v1169_v10  ;;  %1899 = vmatprep.subr.bf16.mxu0 %v2453_v22 }
 0x586   : > { %1905 = vmatprep.subr.bf16.mxu1 %v2453_v22 }
 0x587   : > { %1890 = vmatmul.mubr.msk.bf16.vlgmr.msra.gmra.mrb[8].mxu0 %vm1073_vm10, %v1118_v24 }
 0x588   : > { %v1215_v25 = vpop.permute.xlu1 %1214  ;;  %1901 = vmatprep.mubr.msk.bf16.mxu0 %vm2454_vm1, %v2453_v22 }
 0x589   : > { %1900 = vmatpush3.bf16.msra.mxu0 %v1215_v25 }
 0x58a   : > { %v2127_v26 = vpop.eup %2126  ;;  %1911 = vmatprep.subr.bf16.mxu0 %v2453_v22 }
 0x58b   : > { %v2129_v27 = vpop.eup %2128  ;;  %v1116_v28 = vmul.f32 %v2127_v26, %v2119_v7 }
 0x58c   : > { %v1115_v29 = vmul.f32 %v2129_v27, %v2121_v8  ;;  %v1796_v27 = vld [vmem:[%s3098_s14] ss:$0 sm:$0xff]  ;;  %s3102_s14 = sld [smem:[#allocation33_spill]] }
 0x58d   : > { %v1120_v30 = vpack.c.bf16 %v1116_v28, %v1116_v28 }
 0x58e   : > { %v1119_v31 = vpack.c.bf16 %v1115_v29, %v1115_v29 }
 0x58f   : > { %1902 = vmatmul.mubr.msk.bf16.vlgmr.msra.gmra.mrb[12].mxu0 %vm1073_vm10, %v1120_v30  ;;  %v1797_v30 = vld [vmem:[%s3099_s27] ss:$0 sm:$0xff] }
 0x590   : > { %1896 = vmatmul.mubr.msk.bf16.vlgmr.msra.gmra.mrb[16].mxu1 %vm1073_vm10, %v1119_v31  ;;  %1915 = vmatprep.mubr.msk.bf16.mxu0 %vm2454_vm1, %v2453_v22 }
 0x591   : > { %1907 = vmatprep.mubr.msk.bf16.mxu1 %vm2454_vm1, %v2453_v22  ;;  %1912 = vmatpush3.bf16.msra.mxu0 %v2096_v37 }
 0x592   : > { %1913 = vmatprep.subr.bf16.mxu0 %v2453_v22 }
 0x595   : > { %1914 = vmatpush3.bf16.msra.mxu0 %v2097_v40 }
 0x596   : > { %1927 = vmatprep.subr.bf16.mxu0 %v2453_v22 }
 0x5b9   : > { %v1109_v32 = vpop.xlane.xlu1 %1108 }
 0x5ba   : > { %2130 = vrcp.f32 %v1109_v32 }
 0x5bd   : > { %v1261_v33 = vpop.permute.xlu1 %1260 }
 0x5be   : > { %1906 = vmatpush3.bf16.msra.mxu1 %v1261_v33 }
 0x5bf   : > { %1919 = vmatprep.subr.bf16.mxu1 %v2453_v22 }
 0x5c4   : > { %v2131_v34 = vpop.eup %2130 }
 0x5c5   : > { %v1117_v35 = vmul.f32 %v2131_v34, %v2123_v15  ;;  %v2102_v34 = vld [vmem:[%s3050_s12 + $0x10] sm:$0xff]  }
 0x5c7   : > { %v1121_v36 = vpack.c.bf16 %v1117_v35, %v1117_v35  ;;  %v2103_v35 = vld [vmem:[%s3050_s12 + $0x18] sm:$0xff]  }
 0x5c9   : > { %1908 = vmatmul.mubr.msk.bf16.vlgmr.msra.gmra.mrb[20].mxu1 %vm1073_vm10, %v1121_v36  ;;  %v1798_v36 = vld [vmem:[%s3101_s29] ss:$0 sm:$0xff]  ;;  %s2338_s29 = scalar_lea.vmem %s2337_s22, 256 }
 0x5ca   : > { %1923 = vmatprep.mubr.msk.bf16.mxu1 %vm2454_vm1, %v2453_v22  ;;  %1920 = vmatpush3.bf16.msra.mxu1 %v2098_v16 }
 0x5cb   : > { %1921 = vmatprep.subr.bf16.mxu1 %v2453_v22 }
 0x65a   : > { %v1162_v38 = vpop.f32.mrb[8].mxu0 }
 0x65b   : > { %v1891_v39 = vpop.f32.mrb[9].mxu0  ;;  %v1306_v59 = vpack.c.bf16 %v1162_v38, %v1162_v38 }
 0x65c   : > { %v1165_v41 = vpop.f32.mrb[10].mxu0 }
 0x65d   : > { %v1892_v42 = vpop.f32.mrb[11].mxu0 }
 0x662   : > { %v1254_v43 = vpop.f32.mrb[12].mxu0 }
 0x663   : > { %v1208_v44 = vpop.f32.mrb[16].mxu1  ;;  %v1308_v45 = vpack.c.bf16 %v1254_v43, %v1254_v43  ;;  %v1903_v46 = vpop.f32.mrb[13].mxu0 }
 0x664   : > { %v1307_v47 = vpack.c.bf16 %v1208_v44, %v1208_v44  ;;  %v1897_v48 = vpop.f32.mrb[17].mxu1  ;;  %v1257_v49 = vpop.f32.mrb[14].mxu0 }
 0x665   : > { %v1211_v50 = vpop.f32.mrb[18].mxu1  ;;  %1314 = vrot.lane.b32.xlu1 %v1308_v45, %s2459_s0  ;;  %v1904_v51 = vpop.f32.mrb[15].mxu0 }
 0x666   : > { %1311 = vrot.lane.b32.xlu0 %v1307_v47, %s2460_s18  ;;  %v1898_v52 = vpop.f32.mrb[19].mxu1  ;;  %s3100_s18 = sld [smem:[#allocation21_spill]] }
 0x66c   : > { %s629_s26 = sand.u32 1, %s3100_s18  }
 0x66d   : > { %s1770_s17 = sshll.u32 %s629_s26, 3  ;;  %s1584_s24 = scalar_lea.sflag [#allocation4], %s629_s26 }
 0x66e   : > { %s631_s27 = scalar_lea.vmem [#allocation14], %s1770_s17 }
 0x66f   : > { %s1599_s16 = sshll.u32 %s631_s27, 4  ;;  %s2986_s16 = int_to_ptr.vmem [resolvable:$true] %s1599_s16 }
 0x670   : > { %s2332_s13 = scalar_lea.vmem %s2986_s16, 128  ;;  %p2339_p4 = scmp.lt.s32.totalorder %s2986_s16, %s2337_s22 }
 0x671   : > { %p2333_p8 = scmp.ne.s32.totalorder %s2986_s16, %s2332_s13  ;;  %p2340_p5 = scmp.lt.s32.totalorder %s2338_s29, %s2332_s13 }
 0x673   : > { %p2334_p12 = pnand %p2333_p8, %p3105_p10  ;;  %p2341_p6 = por %p2340_p5, %p2339_p4 }
 0x675   : > { %p2335_p1 = pneg %p2334_p12 }
 0x677   : > { %p2342_p7 = pnand %p2341_p6, %p2335_p1 }
 0x69c   : > { %v1300_v53 = vpop.f32.mrb[20].mxu1 }
 0x69d   : > { %v1309_v54 = vpack.c.bf16 %v1300_v53, %v1300_v53  ;;  %v1909_v55 = vpop.f32.mrb[21].mxu1 }
 0x69e   : > { %v1303_v56 = vpop.f32.mrb[22].mxu1 }
 0x69f   : > { %1317 = vrot.lane.b32.xlu0 %v1309_v54, %s2461_s11  ;;  %v1910_v57 = vpop.f32.mrb[23].mxu1  ;;  %s3104_s11 = sld [smem:[#allocation36_spill]] }
 0x6a5   : > { %s2984_s25 = scalar_lea.hbm %s3104_s11, %s1810_s28 }
 0x6d7   : > { %v1315_v60 = vpop.permute.xlu1 %1314 }
 0x6d8   : > { %v1312_v58 = vpop.permute.xlu0 %1311 }
 0x6d9   : > { %v1321_v61 = vsel %vm888_vm8, %v1306_v59, %v1312_v58 }
 0x6da   : > { %v1323_v62 = vsel %vm1073_vm10, %v1321_v61, %v1315_v60 }
 0x711   : > { %v1318_v63 = vpop.permute.xlu0 %1317 }
 0x712   : > { %v1326_v0 = vsel %vm1324_vm11, %v1323_v62, %v1318_v63 }
 0x713   : > { %1916 = vmatmul.mubr.msk.bf16.vlgmr.msra.gmra.mrb[16].mxu0 %vm649_vm0, %v1326_v0 }
 0x714   : > { %1935 = vmatprep.mubr.msk.bf16.mxu0 %vm2454_vm1, %v2453_v22  ;;  %1928 = vmatpush3.bf16.msra.mxu0 %v2100_v17 }
 0x715   : > { %1929 = vmatprep.subr.bf16.mxu0 %v2453_v22 }
 0x718   : > { %1930 = vmatpush3.bf16.msra.mxu0 %v2101_v18 }
 0x719   : > { %1931 = vmatprep.subr.bf16.mxu0 %v2453_v22 }
 0x71c   : > { %1932 = vmatpush3.bf16.msra.mxu0 %v2102_v34 }
 0x71d   : > { %1933 = vmatprep.subr.bf16.mxu0 %v2453_v22  ;;  %v1802_v22 = vld [vmem:[%s3102_s14] ss:$0 sm:$0xff] }
 0x720   : > { %1934 = vmatpush3.bf16.msra.mxu0 %v2103_v35 }
 0x7e6   : > { %v1386_v3 = vpop.f32.mrb[16].mxu0 }
 0x7e7   : > { %v1387_v4 = vadd.f32 %v1792_v2, %v1386_v3  ;;  %v1917_v5 = vpop.f32.mrb[17].mxu0 }
 0x7e8   : > { %v1389_v6 = vpop.f32.mrb[18].mxu0 }
 0x7e9   : > { %v2936_v7 = vadd.f32 %v1387_v4, %v2818_v1  ;;  %v1918_v8 = vpop.f32.mrb[19].mxu0  ;;  %v2099_v1 = vld [vmem:[%s3048_s10 + $0x8] sm:$0xff]  }
 0x7ea   : > { %1922 = vmatpush3.bf16.msra.mxu1 %v2099_v1 }
 0x7eb   : > { %v1395_v9 = vsel %vm649_vm0, %v2936_v7, 0.0 }
 0x7ec   : > { %1396 = vadd.xlane.f32.xlu1 %v1395_v9 }
 0x879   : > { %v1397_v11 = vpop.xlane.xlu1 %1396 }
 0x87a   : > { %v1398_v12 = vmul.f32 0.03125, %v1397_v11 }
 0x87c   : > { %v1399_v13 = vsub.f32 %v2936_v7, %v1398_v12 }
 0x87e   : > { %v1400_v14 = vmul.f32 %v1399_v13, %v1399_v13  ;;  %v1420_v28 = vmul.f32 %v1796_v27, %v1399_v13 }
 0x880   : > { %v1401_v15 = vsel %vm649_vm0, %v1400_v14, 0.0 }
 0x881   : > { %1402 = vadd.xlane.f32.xlu0 %v1401_v15 }
 0x90e   : > { %v1403_v21 = vpop.xlane.xlu0 %1402 }
 0x90f   : > { %v1404_v23 = vmul.f32 0.032258064, %v1403_v21 }
 0x911   : > { %2132 = vrsqrt.f32 %v1404_v23  ;;  %vm1407_vm12 = vcmp.eq.f32.partialorder %v1404_v23, inf  ;;  %v1410_v10 = vand.u32 2147483648, %v1404_v23  ;;  %vm1409_vm13 = vcmp.eq.f32.partialorder %v1404_v23, 0.0 }
 0x91b   : > { %v2133_v20 = vpop.eup %2132 }
 0x91c   : > { %v1406_v19 = vmul.f32 %v2133_v20, %v1404_v23 }
 0x91e   : > { %v1408_v24 = vsel %vm1407_vm12, %v1404_v23, %v1406_v19 }
 0x91f   : > { %v1411_v25 = vsel %vm1409_vm13, %v1410_v10, %v1408_v24 }
 0x920   : > { %v1412_v26 = vadd.f32 1e-06, %v1411_v25 }
 0x922   : > { %2134 = vrcp.f32 %v1412_v26 }
 0x92c   : > { %v2135_v29 = vpop.eup %2134 }
 0x92d   : > { %v1421_v31 = vmul.f32 %v2135_v29, %v1420_v28 }
 0x92f   : > { %v1428_v32 = vadd.f32 %v1797_v30, %v1421_v31 }
 0x931   : > { %v1429_v33 = vpack.c.bf16 %v1428_v32, %v1428_v32 }
 0x933   : > { %1924 = vmatmul.mubr.msk.bf16.vlgmr.msra.gmra.mrb[24].mxu1 %vm649_vm0, %v1429_v33 }
 0xa06   : > { %v1490_v37 = vpop.f32.mrb[24].mxu1 }
 0xa07   : > { %v1491_v38 = vadd.f32 %v1798_v36, %v1490_v37  ;;  %v1925_v39 = vpop.f32.mrb[25].mxu1 }
 0xa08   : > { %v1493_v40 = vpop.f32.mrb[26].mxu1 }
 0xa09   : > { %v1496_v41 = vmax.f32 %v1491_v38, 0.0  ;;  %v1926_v42 = vpop.f32.mrb[27].mxu1 }
 0xa0b   : > { %v1497_v43 = vpack.c.bf16 %v1496_v41, %v1496_v41 }
 0xa0d   : > { %1936 = vmatmul.mubr.msk.bf16.vlgmr.msra.gmra.mrb[20].mxu0 %vm1537_vm14, %v1497_v43 }
 0xae0   : > { %v1575_v44 = vpop.f32.mrb[20].mxu0 }
 0xae1   : > { %v1576_v45 = vadd.f32 %v1802_v22, %v1575_v44  ;;  %v1937_v46 = vpop.f32.mrb[21].mxu0 }
 0xae2   : > { %v1578_v47 = vpop.f32.mrb[22].mxu0 }
 0xae3   : > { %v1581_v48 = vadd.f32 %v1576_v45, %v2936_v7  ;;  %v1938_v49 = vpop.f32.mrb[23].mxu0 }
 0xae5   : > { %1582 = vst.msk [vmem:[%s631_s27] sm:$0xff] %vm649_vm0, %v1581_v48 }
 0xae6   : > { %2345 = shalt.err (!%p2342_p7)
}
 0xae7   : > { %s2346_s26 = scalar_lea.hbm %s2984_s25, 128  ;;  %s2350_s19 = scalar_lea.hbm %s3104_s11, 512 }
 0xae8   : > { %p2347_p9 = scmp.ne.s32.totalorder %s2984_s25, %s2346_s26  ;;  %p2351_p3 = scmp.lt.u32.totalorder %s2984_s25, %s3104_s11 }
 0xae9   : > { %p2352_p2 = scmp.lt.u32.totalorder %s2350_s19, %s2346_s26  ;;  %p2354_p8 = scmp.lt.u32.totalorder %s2346_s26, %s2984_s25 }
 0xaea   : > { %p2348_p11 = pnand %p2347_p9, %p3105_p10 }
 0xaeb   : > { %p2353_p0 = por %p2352_p2, %p2351_p3 }
 0xaec   : > { %p2349_p13 = pneg %p2348_p11 }
 0xaed   : > { %p2355_p12 = por %p2354_p8, %p2353_p0 }
 0xaef   : > { %p2356_p1 = pnand %p2355_p12, %p2349_p13 }
 0xaf1   : > { %2359 = shalt.err (!%p2356_p1)
}
 0xaf2   : > { %1967 = dma.vmem_to_hbm [thread:$0]  (%p3105_p10), %s2986_s16, 128, %s2984_s25, %s1584_s24  }
 0xaf3 PF: > { %s3106_s14 = sld [smem:[#allocation25_spill]]  ;;  %s3107_s28 = sld [smem:[#allocation20_spill]] }
 0xaf4   : > { %s3108_s27 = sld [smem:[#allocation29_spill]] }
 0xaf9   : > { %p2009_p4 = scmp.ge.s32.totalorder %s3106_s14, 2  ;;  %s1611_s0 = sand.u32 1, %s3107_s28  }
 0xafa   : > { %p3109_p5 = scmp.ne.s32.totalorder %s3108_s27, 0  ;;  %s1612_s18 = scalar_lea.sflag [#allocation4], %s1611_s0 }
 0xafc   : > { %p1992_p6 = pnand %p2009_p4, %p3109_p5 }
 0xafe   : > { %2409 = dma.done.wait (!%p1992_p6), %s1612_s18, 128  }
 0xaff   : > { %2411 = vsyncadd (!%p1992_p6), %s1612_s18, 4294967168  ;;  %s33_s28 = sadd.s32 1, %s3106_s14   ;;  %s3110_s21 = sld [smem:[#allocation21_spill]] }
 0xb00   : > { %p30_p7 = scmp.ge.s32.totalorder %s33_s28, 6   ;;  %s3111_s22 = sld [smem:[#allocation22_spill]] }
 0xb01   : > { %s3112_s23 = sld [smem:[#allocation30_spill]]  ;;  %s3113_s24 = sld [smem:[#allocation23_spill]] }
 0xb02   : > { %s3114_s25 = sld [smem:[#allocation24_spill]]  ;;  %s3115_s26 = sld [smem:[#allocation26_spill]] }
 0xb03   : > { %s3116_s27 = sld [smem:[#allocation28_spill]]  ;;  %32 = sbr.rel (!%p30_p7) target bundleno = 16 (0x10), region = 152 }
 0xb0a   :  { %1617 = vsyncpa [#allocation3], 1 }
 0xb0b   :  { %1619 = vsyncpa [#allocation3 + $0x1], 1 }
 0xb0c   :  { %1620 = vsyncpa [#allocation6], 1 }
 0xb0d   :  { %1621 = vsyncpa [#allocation9], 1 }
 0xb0e   :  { %1622 = vsyncpa [#allocation12], 1 }
 0xb0f   :  { %1623 = vsyncpa [#allocation4], 1 }
 0xb10   :  { %1625 = vsyncpa [#allocation4 + $0x1], 1 }

</bundles_post_ra>
